<compile_context>
chip_gen: v5e
topology: v5e:2x2
jax: 0.10.0
libtpu: 0.0.40
codegen_flags: <defaults>
</compile_context>

<pallas_src>
import functools
import math

import jax
import jax.numpy as jnp
from jax import lax
from jax.experimental import pallas as pl
from jax.experimental.pallas import tpu as pltpu


# Large negative used for key-padding masking; exp(x - max) underflows to 0.0
# exactly like PyTorch's -inf masked_fill for any row that is not fully masked.
NEG_INF = -1e30
LN_EPS = 1e-5
# MXU-native operand dtype on v5e/v6e/v7x (f32 matmuls are ~3x emulation).
# Accumulation / softmax / LayerNorm math stays in f32.  Flip to jnp.float32
# for bit-closer parity with the f32 PyTorch reference.
MXU_DTYPE = jnp.bfloat16
# Explicit scoped-VMEM request (safe on v5e/v6e/v7x); raise + add F/Lk tiling
# for production D / dim_ff / sequence lengths.
VMEM_LIMIT_BYTES = 32 * 1024 * 1024


# ----------------------------------------------------------------------------
# In-kernel helpers
# ----------------------------------------------------------------------------
def _layernorm(z, gamma, beta):
    mu = jnp.mean(z, axis=-1, keepdims=True)
    var = jnp.mean(jnp.square(z - mu), axis=-1, keepdims=True)
    return (z - mu) * lax.rsqrt(var + LN_EPS) * gamma + beta


def _pick_row_tile(n, max_tile):
    """Largest multiple-of-8 divisor of n, <= max_tile (prefers grid >= 2)."""
    if n % 8 != 0:
        return n
    target = min(max_tile, n // 2 if n >= 16 else n)
    target = max(8, target - (target % 8))
    best = None
    t = 8
    while t <= target:
        if n % t == 0:
            best = t
        t += 8
    return best if best is not None else n


# ----------------------------------------------------------------------------
# Fused attention block kernel:
#   query   = q_x + q_pos ; key = kv_x + kv_pos ; value = kv_x
#   out     = LayerNorm(q_x + MHA(query, key, value))
# Grid = (batch, q-tile, head).  The head axis is a reduction ("arbitrary")
# axis: each step computes one head's attention and accumulates its partial
# output projection into an f32 VMEM scratch; the residual + LayerNorm epilogue
# runs on the last head.
# ----------------------------------------------------------------------------
def fused_attn_kernel(q_x_ref, q_pos_ref, kv_x_ref, kv_pos_ref, kpm_ref, *refs,
                      nhead, has_attn_mask, need_weights):
    idx = 0
    amask_ref = None
    if has_attn_mask:
        amask_ref = refs[idx]
        idx += 1
    (wq_ref, wk_ref, wv_ref, bq_ref, bk_ref, bv_ref,
     wo_ref, bo_ref, g_ref, beta_ref) = refs[idx:idx + 10]
    idx += 10
    o_ref = refs[idx]
    idx += 1
    w_ref = None
    if need_weights:
        w_ref = refs[idx]
        idx += 1
    acc_ref = refs[idx]          # (tq, D)  f32 output-projection accumulator
    wacc_ref = refs[idx + 1]     # (tq, Lk) f32 head-summed attention weights

    h_idx = pl.program_id(2)
    last_h = pl.num_programs(2) - 1
    dh = wq_ref.shape[-1]
    scale = 1.0 / math.sqrt(dh)

    @pl.when(h_idx == 0)
    def _init():
        acc_ref[...] = jnp.zeros_like(acc_ref)
        if need_weights:
            wacc_ref[...] = jnp.zeros_like(wacc_ref)

    x_res = q_x_ref[0]                                   # (tq, D) f32 residual
    q_src = (x_res + q_pos_ref[0]).astype(MXU_DTYPE)     # (tq, D)
    k_src = (kv_x_ref[0] + kv_pos_ref[0]).astype(MXU_DTYPE)   # (Lk, D)
    v_src = kv_x_ref[0].astype(MXU_DTYPE)                # (Lk, D)

    # Per-head projections: bf16 operands, f32 accumulation.  Weight slabs are
    # sliced per head by the BlockSpec, never by in-kernel lane slicing.
    q_h = jnp.dot(q_src, wq_ref[0], preferred_element_type=jnp.float32) + bq_ref[0]
    k_h = jnp.dot(k_src, wk_ref[0], preferred_element_type=jnp.float32) + bk_ref[0]
    v_h = jnp.dot(v_src, wv_ref[0], preferred_element_type=jnp.float32) + bv_ref[0]

    # Combined additive mask, built and applied in f32 after the bf16 matmul.
    mask = jnp.where(kpm_ref[0] > 0.5, NEG_INF, 0.0)     # (1, Lk)
    if has_attn_mask:
        mask = amask_ref[...] + mask                     # (tq, Lk)

    s = jnp.dot(q_h.astype(MXU_DTYPE), k_h.T.astype(MXU_DTYPE),
                preferred_element_type=jnp.float32) * scale + mask   # (tq, Lk)
    m = jnp.max(s, axis=-1, keepdims=True)
    p = jnp.exp(s - m)
    inv = pl.reciprocal(jnp.sum(p, axis=-1, keepdims=True), approx=True)
    wgt = p * inv                                        # (tq, Lk) f32

    ctx = jnp.dot(wgt.astype(MXU_DTYPE), v_h.astype(MXU_DTYPE),
                  preferred_element_type=jnp.float32)    # (tq, dh)
    # head-merge + output projection fused: concat_h(ctx_h) @ Wo == sum_h ctx_h @ Wo_h
    acc_ref[...] += jnp.dot(ctx.astype(MXU_DTYPE), wo_ref[0],
                            preferred_element_type=jnp.float32)      # (tq, D)
    if need_weights:
        wacc_ref[...] += wgt

    @pl.when(h_idx == last_h)
    def _finalize():
        # residual + out-proj bias + LayerNorm (dropout == identity, eval mode)
        z = x_res + acc_ref[...] + bo_ref[...]
        o_ref[0] = _layernorm(z, g_ref[...], beta_ref[...]).astype(o_ref.dtype)
        if need_weights:
            w_ref[0] = (wacc_ref[...] * (1.0 / nhead)).astype(w_ref.dtype)


def fused_attention_block(q_x, q_pos, kv_x, kv_pos, key_padding_mask, attn_mask,
                          params, ln, nhead, need_weights, max_q_tile=256):
    """q_x/q_pos: (B, Lq, D); kv_x/kv_pos: (B, Lk, D); key_padding_mask: (B, Lk)."""
    B, Lq, D = q_x.shape
    Lk = kv_x.shape[1]
    dh = D // nhead
    in_w, in_b, out_w, out_b = params
    gamma, beta = ln
    f32 = jnp.float32

    # Host-side weight prep (tiny): split fused in_proj into per-head Wq/Wk/Wv
    # slabs, transpose to x @ W layout, cast MXU operands to bf16.
    def per_head_w(w_rows):                     # (D_out, D_in) -> (H, D_in, dh)
        return w_rows.T.reshape(D, nhead, dh).transpose(1, 0, 2).astype(MXU_DTYPE)

    wq_h = per_head_w(in_w[:D])
    wk_h = per_head_w(in_w[D:2 * D])
    wv_h = per_head_w(in_w[2 * D:])
    bq_h = in_b[:D].reshape(nhead, 1, dh).astype(f32)
    bk_h = in_b[D:2 * D].reshape(nhead, 1, dh).astype(f32)
    bv_h = in_b[2 * D:].reshape(nhead, 1, dh).astype(f32)
    wo_h = out_w.T.reshape(nhead, dh, D).astype(MXU_DTYPE)
    bo = out_b.reshape(1, D).astype(f32)

    kpm = key_padding_mask.astype(f32).reshape(B, 1, Lk)
    has_attn_mask = attn_mask is not None

    tq = _pick_row_tile(Lq, max_q_tile)
    grid = (B, Lq // tq, nhead)
    const = lambda b, qi, h: (0, 0)

    in_specs = [
        pl.BlockSpec((1, tq, D), lambda b, qi, h: (b, qi, 0)),    # q_x (residual)
        pl.BlockSpec((1, tq, D), lambda b, qi, h: (b, qi, 0)),    # q_pos
        pl.BlockSpec((1, Lk, D), lambda b, qi, h: (b, 0, 0)),     # kv_x
        pl.BlockSpec((1, Lk, D), lambda b, qi, h: (b, 0, 0)),     # kv_pos
        pl.BlockSpec((1, 1, Lk), lambda b, qi, h: (b, 0, 0)),     # key padding row
    ]
    args = [q_x, q_pos, kv_x, kv_pos, kpm]
    if has_attn_mask:
        in_specs.append(pl.BlockSpec((tq, Lk), lambda b, qi, h: (qi, 0)))
        args.append(attn_mask.astype(f32))
    in_specs += [
        pl.BlockSpec((1, D, dh), lambda b, qi, h: (h, 0, 0)),     # Wq head slab
        pl.BlockSpec((1, D, dh), lambda b, qi, h: (h, 0, 0)),     # Wk head slab
        pl.BlockSpec((1, D, dh), lambda b, qi, h: (h, 0, 0)),     # Wv head slab
        pl.BlockSpec((1, 1, dh), lambda b, qi, h: (h, 0, 0)),     # bq head
        pl.BlockSpec((1, 1, dh), lambda b, qi, h: (h, 0, 0)),     # bk head
        pl.BlockSpec((1, 1, dh), lambda b, qi, h: (h, 0, 0)),     # bv head
        pl.BlockSpec((1, dh, D), lambda b, qi, h: (h, 0, 0)),     # Wo head slab
        pl.BlockSpec((1, D), const),                              # out_proj bias
        pl.BlockSpec((1, D), const),                              # LN gamma
        pl.BlockSpec((1, D), const),                              # LN beta
    ]
    args += [wq_h, wk_h, wv_h, bq_h, bk_h, bv_h, wo_h, bo,
             gamma.reshape(1, D), beta.reshape(1, D)]

    out_spec_o = pl.BlockSpec((1, tq, D), lambda b, qi, h: (b, qi, 0))
    if need_weights:
        out_shape = (jax.ShapeDtypeStruct((B, Lq, D), q_x.dtype),
                     jax.ShapeDtypeStruct((B, Lq, Lk), f32))
        out_specs = (out_spec_o,
                     pl.BlockSpec((1, tq, Lk), lambda b, qi, h: (b, qi, 0)))
    else:
        out_shape = jax.ShapeDtypeStruct((B, Lq, D), q_x.dtype)
        out_specs = out_spec_o

    kernel = functools.partial(fused_attn_kernel, nhead=nhead,
                               has_attn_mask=has_attn_mask,
                               need_weights=need_weights)
    return pl.pallas_call(
        kernel,
        out_shape=out_shape,
        grid=grid,
        in_specs=in_specs,
        out_specs=out_specs,
        scratch_shapes=(pltpu.VMEM((tq, D), f32), pltpu.VMEM((tq, Lk), f32)),
        compiler_params=pltpu.CompilerParams(
            dimension_semantics=("parallel", "parallel", "arbitrary"),
            vmem_limit_bytes=VMEM_LIMIT_BYTES),
    )(*args)


# ----------------------------------------------------------------------------
# Fused FFN block kernel: LayerNorm(x + linear2(relu(linear1(x))))
# Row-tiled over N = B*L with weights resident across grid steps.
# ----------------------------------------------------------------------------
def fused_ffn_kernel(x_ref, w1_ref, b1_ref, w2_ref, b2_ref, g_ref, beta_ref, o_ref):
    x = x_ref[...]                                                   # (tn, D) f32
    h = jnp.dot(x.astype(MXU_DTYPE), w1_ref[...],
                preferred_element_type=jnp.float32) + b1_ref[...]    # (tn, F)
    h = jnp.maximum(h, 0.0)                                          # relu
    y = jnp.dot(h.astype(MXU_DTYPE), w2_ref[...],
                preferred_element_type=jnp.float32) + b2_ref[...]    # (tn, D)
    z = x + y                                                        # residual
    o_ref[...] = _layernorm(z, g_ref[...], beta_ref[...]).astype(o_ref.dtype)


def fused_ffn_block(x, w1, b1, w2, b2, gamma, beta, *, max_rows=512):
    N, D = x.shape
    F = w1.shape[0]
    f32 = jnp.float32
    tn = _pick_row_tile(N, max_rows)
    return pl.pallas_call(
        fused_ffn_kernel,
        out_shape=jax.ShapeDtypeStruct((N, D), x.dtype),
        grid=(N // tn,),
        in_specs=[
            pl.BlockSpec((tn, D), lambda i: (i, 0)),
            pl.BlockSpec((D, F), lambda i: (0, 0)),
            pl.BlockSpec((1, F), lambda i: (0, 0)),
            pl.BlockSpec((F, D), lambda i: (0, 0)),
            pl.BlockSpec((1, D), lambda i: (0, 0)),
            pl.BlockSpec((1, D), lambda i: (0, 0)),
            pl.BlockSpec((1, D), lambda i: (0, 0)),
        ],
        out_specs=pl.BlockSpec((tn, D), lambda i: (i, 0)),
        compiler_params=pltpu.CompilerParams(
            dimension_semantics=("parallel",),
            vmem_limit_bytes=VMEM_LIMIT_BYTES),
    )(x, w1.T.astype(MXU_DTYPE), b1.reshape(1, F).astype(f32),
      w2.T.astype(MXU_DTYPE), b2.reshape(1, D).astype(f32),
      gamma.reshape(1, D), beta.reshape(1, D))


# ----------------------------------------------------------------------------
# DecoderLayer: parameters + forward
# ----------------------------------------------------------------------------
def init_decoder_params(key, d_model, dim_ff):
    ks = jax.random.split(key, 10)
    s = 0.05
    f32 = jnp.float32
    return {
        # self attention (PyTorch in_proj layout: (3D, D))
        "sa_in_w": s * jax.random.normal(ks[0], (3 * d_model, d_model), f32),
        "sa_in_b": s * jax.random.normal(ks[1], (3 * d_model,), f32),
        "sa_out_w": s * jax.random.normal(ks[2], (d_model, d_model), f32),
        "sa_out_b": jnp.zeros((d_model,), f32),
        # cross (corr) attention
        "ca_in_w": s * jax.random.normal(ks[3], (3 * d_model, d_model), f32),
        "ca_in_b": s * jax.random.normal(ks[4], (3 * d_model,), f32),
        "ca_out_w": s * jax.random.normal(ks[5], (d_model, d_model), f32),
        "ca_out_b": jnp.zeros((d_model,), f32),
        # feedforward
        "w1": s * jax.random.normal(ks[6], (dim_ff, d_model), f32),
        "b1": s * jax.random.normal(ks[7], (dim_ff,), f32),
        "w2": s * jax.random.normal(ks[8], (d_model, dim_ff), f32),
        "b2": s * jax.random.normal(ks[9], (d_model,), f32),
        # layer norms
        "ln1_g": jnp.ones((d_model,), f32), "ln1_b": jnp.zeros((d_model,), f32),
        "ln2_g": jnp.ones((d_model,), f32), "ln2_b": jnp.zeros((d_model,), f32),
        "ln3_g": jnp.ones((d_model,), f32), "ln3_b": jnp.zeros((d_model,), f32),
    }


def decoder_layer_forward(p, tgt, tgt_pos, memory, memory_pos,
                          tgt_padding_mask, memory_padding_mask, tgt_attn_mask,
                          nhead):
    # One layout change at entry (seq-first -> batch-first) and one at exit; no
    # transposes between the three fused kernels.  (Blocking (Lq,1,D) straight
    # out of the (L,B,D) layout would put a size-1 block on the second-minor
    # dim, violating the (8,128)/full-dim BlockSpec rule for small B.)
    tgt_b = tgt.transpose(1, 0, 2)            # (B, Lt, D)
    tgt_pos_b = tgt_pos.transpose(1, 0, 2)
    mem_b = memory.transpose(1, 0, 2)         # (B, Lm, D)
    mem_pos_b = memory_pos.transpose(1, 0, 2)

    # --- self attention: q = k = tgt + tgt_pos, value = tgt; + residual + LN1 ---
    x = fused_attention_block(
        tgt_b, tgt_pos_b, tgt_b, tgt_pos_b,
        tgt_padding_mask, tgt_attn_mask,
        (p["sa_in_w"], p["sa_in_b"], p["sa_out_w"], p["sa_out_b"]),
        (p["ln1_g"], p["ln1_b"]), nhead, need_weights=False)

    # --- cross attention: q = x + tgt_pos, k = memory + memory_pos, v = memory ---
    x, attn = fused_attention_block(
        x, tgt_pos_b, mem_b, mem_pos_b,
        memory_padding_mask, None,
        (p["ca_in_w"], p["ca_in_b"], p["ca_out_w"], p["ca_out_b"]),
        (p["ln2_g"], p["ln2_b"]), nhead, need_weights=True)

    # --- feedforward (relu) + residual + LN3, row-tiled ---
    B, Lt, D = x.shape
    y = fused_ffn_block(x.reshape(B * Lt, D),
                        p["w1"], p["b1"], p["w2"], p["b2"],
                        p["ln3_g"], p["ln3_b"])
    out = y.reshape(B, Lt, D).transpose(1, 0, 2)   # back to (Lt, B, D)
    return out, attn                                # attn: (B, Lt, Lm), head-averaged


# ----------------------------------------------------------------------------
if __name__ == "__main__":
    d_model, nhead, dim_ff = 32, 4, 64
    Lt, Lm, B = 8, 12, 2

    key = jax.random.PRNGKey(0)
    kp, kt, ktp, km, kmp = jax.random.split(key, 5)
    params = init_decoder_params(kp, d_model, dim_ff)

    tgt = jax.random.normal(kt, (Lt, B, d_model), jnp.float32)
    tgt_pos = jax.random.normal(ktp, (Lt, B, d_model), jnp.float32)
    memory = jax.random.normal(km, (Lm, B, d_model), jnp.float32)
    memory_pos = jax.random.normal(kmp, (Lm, B, d_model), jnp.float32)

    # key padding masks (True = pad), causal float attn mask for self-attention
    tgt_padding_mask = jnp.zeros((B, Lt), bool).at[1, Lt - 1].set(True)
    memory_padding_mask = jnp.zeros((B, Lm), bool).at[1, Lm - 2:].set(True)
    causal = jnp.where(
        jnp.triu(jnp.ones((Lt, Lt), bool), k=1), NEG_INF, 0.0
    ).astype(jnp.float32)

    fwd = jax.jit(functools.partial(decoder_layer_forward, nhead=nhead))
    out, attn = fwd(params, tgt, tgt_pos, memory, memory_pos,
                    tgt_padding_mask, memory_padding_mask, causal)
    jax.block_until_ready((out, attn))

    assert out.shape == (Lt, B, d_model), out.shape
    assert attn.shape == (B, Lt, Lm), attn.shape
    assert bool(jnp.all(jnp.isfinite(out))) and bool(jnp.all(jnp.isfinite(attn)))
    print("KERNEL_OK")
</pallas_src>

<mosaic_0001>
module attributes {stable_mosaic.version = 11 : i64} {
  func.func @fused_attn_kernel(%arg0: i32, %arg1: i32, %arg2: i32, %arg3: memref<1x8x32xf32, #tpu.memory_space<vmem>>, %arg4: memref<1x8x32xf32, #tpu.memory_space<vmem>>, %arg5: memref<1x8x32xf32, #tpu.memory_space<vmem>>, %arg6: memref<1x8x32xf32, #tpu.memory_space<vmem>>, %arg7: memref<1x1x8xf32, #tpu.memory_space<vmem>>, %arg8: memref<8x8xf32, #tpu.memory_space<vmem>>, %arg9: memref<1x32x8xbf16, #tpu.memory_space<vmem>>, %arg10: memref<1x32x8xbf16, #tpu.memory_space<vmem>>, %arg11: memref<1x32x8xbf16, #tpu.memory_space<vmem>>, %arg12: memref<1x1x8xf32, #tpu.memory_space<vmem>>, %arg13: memref<1x1x8xf32, #tpu.memory_space<vmem>>, %arg14: memref<1x1x8xf32, #tpu.memory_space<vmem>>, %arg15: memref<1x8x32xbf16, #tpu.memory_space<vmem>>, %arg16: memref<1x32xf32, #tpu.memory_space<vmem>>, %arg17: memref<1x32xf32, #tpu.memory_space<vmem>>, %arg18: memref<1x32xf32, #tpu.memory_space<vmem>>, %arg19: memref<1x8x32xf32, #tpu.memory_space<vmem>>, %arg20: memref<8x32xf32, #tpu.memory_space<vmem>>, %arg21: memref<8x8xf32, #tpu.memory_space<vmem>>) attributes {dimension_semantics = [#tpu.dimension_semantics<parallel>, #tpu.dimension_semantics<parallel>, #tpu.dimension_semantics<arbitrary>], iteration_bounds = array<i64: 2, 1, 4>, scalar_prefetch = 0 : i64, scratch_operands = 2 : i64, tpu.core_type = #tpu.core_type<tc>, window_params = [{transform_indices = @transform_0, window_bounds = array<i64: 1, 8, 32>}, {transform_indices = @transform_1, window_bounds = array<i64: 1, 8, 32>}, {transform_indices = @transform_2, window_bounds = array<i64: 1, 8, 32>}, {transform_indices = @transform_3, window_bounds = array<i64: 1, 8, 32>}, {transform_indices = @transform_4, window_bounds = array<i64: 1, 1, 8>}, {transform_indices = @transform_5, window_bounds = array<i64: 8, 8>}, {transform_indices = @transform_6, window_bounds = array<i64: 1, 32, 8>}, {transform_indices = @transform_7, window_bounds = array<i64: 1, 32, 8>}, {transform_indices = @transform_8, window_bounds = array<i64: 1, 32, 8>}, {transform_indices = @transform_9, window_bounds = array<i64: 1, 1, 8>}, {transform_indices = @transform_10, window_bounds = array<i64: 1, 1, 8>}, {transform_indices = @transform_11, window_bounds = array<i64: 1, 1, 8>}, {transform_indices = @transform_12, window_bounds = array<i64: 1, 8, 32>}, {pipeline_mode = #tpu.pipeline_mode<synchronous>, transform_indices = @transform_13, window_bounds = array<i64: 1, 32>}, {pipeline_mode = #tpu.pipeline_mode<synchronous>, transform_indices = @transform_14, window_bounds = array<i64: 1, 32>}, {pipeline_mode = #tpu.pipeline_mode<synchronous>, transform_indices = @transform_15, window_bounds = array<i64: 1, 32>}, {transform_indices = @transform_16, window_bounds = array<i64: 1, 8, 32>}]} {
    %c0_i32 = arith.constant 0 : i32
    %0 = arith.cmpi eq, %arg2, %c0_i32 : i32
    %1 = arith.extui %0 : i1 to i32
    %c0_i32_0 = arith.constant 0 : i32
    %2 = arith.cmpi ne, %1, %c0_i32_0 : i32
    scf.if %2 {
      %cst_57 = arith.constant 0.000000e+00 : f32
      %79 = vector.broadcast %cst_57 : f32 to vector<8x32xf32>
      %c0_58 = arith.constant 0 : index
      %c0_59 = arith.constant 0 : index
      %80 = vector.load %arg20[%c0_58, %c0_59] : memref<8x32xf32, #tpu.memory_space<vmem>>, vector<8x32xf32>
      tpu.vector_store %arg20[%c0_58, %c0_59], %79 {strides = array<i32>} : memref<8x32xf32, #tpu.memory_space<vmem>>, vector<8x32xf32>,
    } else {
    }
    %c0 = arith.constant 0 : index
    %c0_1 = arith.constant 0 : index
    %c0_2 = arith.constant 0 : index
    %3 = vector.load %arg3[%c0, %c0_1, %c0_2] : memref<1x8x32xf32, #tpu.memory_space<vmem>>, vector<1x8x32xf32>
    %4 = vector.shape_cast %3 : vector<1x8x32xf32> to vector<8x32xf32>
    %c0_3 = arith.constant 0 : index
    %c0_4 = arith.constant 0 : index
    %c0_5 = arith.constant 0 : index
    %5 = vector.load %arg4[%c0_3, %c0_4, %c0_5] : memref<1x8x32xf32, #tpu.memory_space<vmem>>, vector<1x8x32xf32>
    %6 = vector.shape_cast %5 : vector<1x8x32xf32> to vector<8x32xf32>
    %7 = arith.addf %4, %6 : vector<8x32xf32>
    %8 = arith.truncf %7 : vector<8x32xf32> to vector<8x32xbf16>
    %c0_6 = arith.constant 0 : index
    %c0_7 = arith.constant 0 : index
    %c0_8 = arith.constant 0 : index
    %9 = vector.load %arg5[%c0_6, %c0_7, %c0_8] : memref<1x8x32xf32, #tpu.memory_space<vmem>>, vector<1x8x32xf32>
    %10 = vector.shape_cast %9 : vector<1x8x32xf32> to vector<8x32xf32>
    %c0_9 = arith.constant 0 : index
    %c0_10 = arith.constant 0 : index
    %c0_11 = arith.constant 0 : index
    %11 = vector.load %arg6[%c0_9, %c0_10, %c0_11] : memref<1x8x32xf32, #tpu.memory_space<vmem>>, vector<1x8x32xf32>
    %12 = vector.shape_cast %11 : vector<1x8x32xf32> to vector<8x32xf32>
    %13 = arith.addf %10, %12 : vector<8x32xf32>
    %14 = arith.truncf %13 : vector<8x32xf32> to vector<8x32xbf16>
    %c0_12 = arith.constant 0 : index
    %c0_13 = arith.constant 0 : index
    %c0_14 = arith.constant 0 : index
    %15 = vector.load %arg5[%c0_12, %c0_13, %c0_14] : memref<1x8x32xf32, #tpu.memory_space<vmem>>, vector<1x8x32xf32>
    %16 = vector.shape_cast %15 : vector<1x8x32xf32> to vector<8x32xf32>
    %17 = arith.truncf %16 : vector<8x32xf32> to vector<8x32xbf16>
    %c0_15 = arith.constant 0 : index
    %c0_16 = arith.constant 0 : index
    %c0_17 = arith.constant 0 : index
    %18 = vector.load %arg9[%c0_15, %c0_16, %c0_17] : memref<1x32x8xbf16, #tpu.memory_space<vmem>>, vector<1x32x8xbf16>
    %19 = vector.shape_cast %18 : vector<1x32x8xbf16> to vector<32x8xbf16>
    %cst = arith.constant dense<0.000000e+00> : vector<8x8xf32>
    %20 = tpu.matmul %8, %19, %cst {dimension_numbers = #tpu.dot_dimension_numbers<[1], [0], [0], [1], [0, 0, 1, 1], [], []>} : vector<8x32xbf16>, vector<32x8xbf16>, vector<8x8xf32> -> vector<8x8xf32>
    %c0_18 = arith.constant 0 : index
    %c0_19 = arith.constant 0 : index
    %c0_20 = arith.constant 0 : index
    %21 = vector.load %arg12[%c0_18, %c0_19, %c0_20] : memref<1x1x8xf32, #tpu.memory_space<vmem>>, vector<1x1x8xf32>
    %22 = vector.shape_cast %21 : vector<1x1x8xf32> to vector<1x8xf32>
    %23 = vector.broadcast %22 : vector<1x8xf32> to vector<8x8xf32>
    %24 = arith.addf %20, %23 : vector<8x8xf32>
    %c0_21 = arith.constant 0 : index
    %c0_22 = arith.constant 0 : index
    %c0_23 = arith.constant 0 : index
    %25 = vector.load %arg10[%c0_21, %c0_22, %c0_23] : memref<1x32x8xbf16, #tpu.memory_space<vmem>>, vector<1x32x8xbf16>
    %26 = vector.shape_cast %25 : vector<1x32x8xbf16> to vector<32x8xbf16>
    %cst_24 = arith.constant dense<0.000000e+00> : vector<8x8xf32>
    %27 = tpu.matmul %14, %26, %cst_24 {dimension_numbers = #tpu.dot_dimension_numbers<[1], [0], [0], [1], [0, 0, 1, 1], [], []>} : vector<8x32xbf16>, vector<32x8xbf16>, vector<8x8xf32> -> vector<8x8xf32>
    %c0_25 = arith.constant 0 : index
    %c0_26 = arith.constant 0 : index
    %c0_27 = arith.constant 0 : index
    %28 = vector.load %arg13[%c0_25, %c0_26, %c0_27] : memref<1x1x8xf32, #tpu.memory_space<vmem>>, vector<1x1x8xf32>
    %29 = vector.shape_cast %28 : vector<1x1x8xf32> to vector<1x8xf32>
    %30 = vector.broadcast %29 : vector<1x8xf32> to vector<8x8xf32>
    %31 = arith.addf %27, %30 : vector<8x8xf32>
    %c0_28 = arith.constant 0 : index
    %c0_29 = arith.constant 0 : index
    %c0_30 = arith.constant 0 : index
    %32 = vector.load %arg11[%c0_28, %c0_29, %c0_30] : memref<1x32x8xbf16, #tpu.memory_space<vmem>>, vector<1x32x8xbf16>
    %33 = vector.shape_cast %32 : vector<1x32x8xbf16> to vector<32x8xbf16>
    %cst_31 = arith.constant dense<0.000000e+00> : vector<8x8xf32>
    %34 = tpu.matmul %17, %33, %cst_31 {dimension_numbers = #tpu.dot_dimension_numbers<[1], [0], [0], [1], [0, 0, 1, 1], [], []>} : vector<8x32xbf16>, vector<32x8xbf16>, vector<8x8xf32> -> vector<8x8xf32>
    %c0_32 = arith.constant 0 : index
    %c0_33 = arith.constant 0 : index
    %c0_34 = arith.constant 0 : index
    %35 = vector.load %arg14[%c0_32, %c0_33, %c0_34] : memref<1x1x8xf32, #tpu.memory_space<vmem>>, vector<1x1x8xf32>
    %36 = vector.shape_cast %35 : vector<1x1x8xf32> to vector<1x8xf32>
    %37 = vector.broadcast %36 : vector<1x8xf32> to vector<8x8xf32>
    %38 = arith.addf %34, %37 : vector<8x8xf32>
    %c0_35 = arith.constant 0 : index
    %c0_36 = arith.constant 0 : index
    %c0_37 = arith.constant 0 : index
    %39 = vector.load %arg7[%c0_35, %c0_36, %c0_37] : memref<1x1x8xf32, #tpu.memory_space<vmem>>, vector<1x1x8xf32>
    %40 = vector.shape_cast %39 : vector<1x1x8xf32> to vector<1x8xf32>
    %cst_38 = arith.constant 5.000000e-01 : f32
    %41 = vector.broadcast %cst_38 : f32 to vector<1x8xf32>
    %42 = arith.cmpf ogt, %40, %41 : vector<1x8xf32>
    %cst_39 = arith.constant -1.000000e+30 : f32
    %cst_40 = arith.constant 0.000000e+00 : f32
    %43 = vector.broadcast %cst_39 : f32 to vector<1x8xf32>
    %44 = vector.broadcast %cst_40 : f32 to vector<1x8xf32>
    %45 = arith.select %42, %43, %44 : vector<1x8xi1>, vector<1x8xf32>
    %c0_41 = arith.constant 0 : index
    %c0_42 = arith.constant 0 : index
    %46 = vector.load %arg8[%c0_41, %c0_42] : memref<8x8xf32, #tpu.memory_space<vmem>>, vector<8x8xf32>
    %47 = vector.broadcast %45 : vector<1x8xf32> to vector<8x8xf32>
    %48 = arith.addf %46, %47 : vector<8x8xf32>
    %49 = arith.truncf %24 : vector<8x8xf32> to vector<8x8xbf16>
    %50 = tpu.transpose %31, [1, 0] : vector<8x8xf32> -> vector<8x8xf32>
    %51 = arith.truncf %50 : vector<8x8xf32> to vector<8x8xbf16>
    %cst_43 = arith.constant dense<0.000000e+00> : vector<8x8xf32>
    %52 = tpu.matmul %49, %51, %cst_43 {dimension_numbers = #tpu.dot_dimension_numbers<[1], [0], [0], [1], [0, 0, 1, 1], [], []>} : vector<8x8xbf16>, vector<8x8xbf16>, vector<8x8xf32> -> vector<8x8xf32>
    %cst_44 = arith.constant 0.353553385 : f32
    %53 = vector.broadcast %cst_44 : f32 to vector<8x8xf32>
    %54 = arith.mulf %52, %53 : vector<8x8xf32>
    %55 = arith.addf %54, %48 : vector<8x8xf32>
    %cst_45 = arith.constant dense<0xFF800000> : vector<8xf32>
    %56 = vector.multi_reduction <maximumf>, %55, %cst_45 [1] : vector<8x8xf32> to vector<8xf32>
    %57 = vector.shape_cast %56 : vector<8xf32> to vector<8x1xf32>
    %58 = vector.broadcast %57 : vector<8x1xf32> to vector<8x8xf32>
    %59 = arith.subf %55, %58 : vector<8x8xf32>
    %60 = math.exp %59 : vector<8x8xf32>
    %cst_46 = arith.constant dense<0.000000e+00> : vector<8xf32>
    %61 = vector.multi_reduction <add>, %60, %cst_46 [1] : vector<8x8xf32> to vector<8xf32>
    %62 = vector.shape_cast %61 : vector<8xf32> to vector<8x1xf32>
    %63 = tpu.reciprocal %62 {approx = true} : vector<8x1xf32> -> vector<8x1xf32>
    %64 = vector.broadcast %63 : vector<8x1xf32> to vector<8x8xf32>
    %65 = arith.mulf %60, %64 : vector<8x8xf32>
    %66 = arith.truncf %65 : vector<8x8xf32> to vector<8x8xbf16>
    %67 = arith.truncf %38 : vector<8x8xf32> to vector<8x8xbf16>
    %cst_47 = arith.constant dense<0.000000e+00> : vector<8x8xf32>
    %68 = tpu.matmul %66, %67, %cst_47 {dimension_numbers = #tpu.dot_dimension_numbers<[1], [0], [0], [1], [0, 0, 1, 1], [], []>} : vector<8x8xbf16>, vector<8x8xbf16>, vector<8x8xf32> -> vector<8x8xf32>
    %c0_48 = arith.constant 0 : index
    %c0_49 = arith.constant 0 : index
    %69 = vector.load %arg20[%c0_48, %c0_49] : memref<8x32xf32, #tpu.memory_space<vmem>>, vector<8x32xf32>
    %70 = arith.truncf %68 : vector<8x8xf32> to vector<8x8xbf16>
    %c0_50 = arith.constant 0 : index
    %c0_51 = arith.constant 0 : index
    %c0_52 = arith.constant 0 : index
    %71 = vector.load %arg15[%c0_50, %c0_51, %c0_52] : memref<1x8x32xbf16, #tpu.memory_space<vmem>>, vector<1x8x32xbf16>
    %72 = vector.shape_cast %71 : vector<1x8x32xbf16> to vector<8x32xbf16>
    %cst_53 = arith.constant dense<0.000000e+00> : vector<8x32xf32>
    %73 = tpu.matmul %70, %72, %cst_53 {dimension_numbers = #tpu.dot_dimension_numbers<[1], [0], [0], [1], [0, 0, 1, 1], [], []>} : vector<8x8xbf16>, vector<8x32xbf16>, vector<8x32xf32> -> vector<8x32xf32>
    %74 = arith.addf %69, %73 : vector<8x32xf32>
    %c0_54 = arith.constant 0 : index
    %c0_55 = arith.constant 0 : index
    %75 = vector.load %arg20[%c0_54, %c0_55] : memref<8x32xf32, #tpu.memory_space<vmem>>, vector<8x32xf32>
    tpu.vector_store %arg20[%c0_54, %c0_55], %74 {strides = array<i32>} : memref<8x32xf32, #tpu.memory_space<vmem>>, vector<8x32xf32>,
    %c3_i32 = arith.constant 3 : i32
    %76 = arith.cmpi eq, %arg2, %c3_i32 : i32
    %77 = arith.extui %76 : i1 to i32
    %c0_i32_56 = arith.constant 0 : i32
    %78 = arith.cmpi ne, %77, %c0_i32_56 : i32
    scf.if %78 {
      %c0_57 = arith.constant 0 : index
      %c0_58 = arith.constant 0 : index
      %79 = vector.load %arg20[%c0_57, %c0_58] : memref<8x32xf32, #tpu.memory_space<vmem>>, vector<8x32xf32>
      %80 = arith.addf %4, %79 : vector<8x32xf32>
      %c0_59 = arith.constant 0 : index
      %c0_60 = arith.constant 0 : index
      %81 = vector.load %arg16[%c0_59, %c0_60] : memref<1x32xf32, #tpu.memory_space<vmem>>, vector<1x32xf32>
      %82 = vector.broadcast %81 : vector<1x32xf32> to vector<8x32xf32>
      %83 = arith.addf %80, %82 : vector<8x32xf32>
      %c0_61 = arith.constant 0 : index
      %c0_62 = arith.constant 0 : index
      %84 = vector.load %arg17[%c0_61, %c0_62] : memref<1x32xf32, #tpu.memory_space<vmem>>, vector<1x32xf32>
      %c0_63 = arith.constant 0 : index
      %c0_64 = arith.constant 0 : index
      %85 = vector.load %arg18[%c0_63, %c0_64] : memref<1x32xf32, #tpu.memory_space<vmem>>, vector<1x32xf32>
      %cst_65 = arith.constant dense<0.000000e+00> : vector<8xf32>
      %86 = vector.multi_reduction <add>, %83, %cst_65 [1] : vector<8x32xf32> to vector<8xf32>
      %87 = vector.shape_cast %86 : vector<8xf32> to vector<8x1xf32>
      %cst_66 = arith.constant 3.200000e+01 : f32
      %88 = vector.broadcast %cst_66 : f32 to vector<8x1xf32>
      %89 = arith.divf %87, %88 : vector<8x1xf32>
      %90 = vector.broadcast %89 : vector<8x1xf32> to vector<8x32xf32>
      %91 = arith.subf %83, %90 : vector<8x32xf32>
      %92 = arith.mulf %91, %91 : vector<8x32xf32>
      %cst_67 = arith.constant dense<0.000000e+00> : vector<8xf32>
      %93 = vector.multi_reduction <add>, %92, %cst_67 [1] : vector<8x32xf32> to vector<8xf32>
      %94 = vector.shape_cast %93 : vector<8xf32> to vector<8x1xf32>
      %cst_68 = arith.constant 3.200000e+01 : f32
      %95 = vector.broadcast %cst_68 : f32 to vector<8x1xf32>
      %96 = arith.divf %94, %95 : vector<8x1xf32>
      %97 = vector.broadcast %89 : vector<8x1xf32> to vector<8x32xf32>
      %98 = arith.subf %83, %97 : vector<8x32xf32>
      %cst_69 = arith.constant 9.99999974E-6 : f32
      %99 = vector.broadcast %cst_69 : f32 to vector<8x1xf32>
      %100 = arith.addf %96, %99 : vector<8x1xf32>
      %101 = math.rsqrt %100 : vector<8x1xf32>
      %102 = vector.broadcast %101 : vector<8x1xf32> to vector<8x32xf32>
      %103 = arith.mulf %98, %102 : vector<8x32xf32>
      %104 = vector.broadcast %84 : vector<1x32xf32> to vector<8x32xf32>
      %105 = arith.mulf %103, %104 : vector<8x32xf32>
      %106 = vector.broadcast %85 : vector<1x32xf32> to vector<8x32xf32>
      %107 = arith.addf %105, %106 : vector<8x32xf32>
      %c0_70 = arith.constant 0 : index
      %c0_71 = arith.constant 0 : index
      %c0_72 = arith.constant 0 : index
      %108 = vector.load %arg19[%c0_70, %c0_71, %c0_72] : memref<1x8x32xf32, #tpu.memory_space<vmem>>, vector<1x8x32xf32>
      %109 = vector.shape_cast %108 : vector<1x8x32xf32> to vector<8x32xf32>
      %110 = vector.shape_cast %107 : vector<8x32xf32> to vector<1x8x32xf32>
      tpu.vector_store %arg19[%c0_70, %c0_71, %c0_72], %110 {strides = array<i32>} : memref<1x8x32xf32, #tpu.memory_space<vmem>>, vector<1x8x32xf32>,
    } else {
    }
    return
  }
  func.func @transform_0(%arg0: i32, %arg1: i32, %arg2: i32) -> (i32, i32, i32) {
    %c0_i32 = arith.constant 0 : i32
    %c0_i32_0 = arith.constant 0 : i32
    return %arg0, %arg1, %c0_i32 : i32, i32, i32
  }
  func.func @transform_1(%arg0: i32, %arg1: i32, %arg2: i32) -> (i32, i32, i32) {
    %c0_i32 = arith.constant 0 : i32
    %c0_i32_0 = arith.constant 0 : i32
    return %arg0, %arg1, %c0_i32 : i32, i32, i32
  }
  func.func @transform_2(%arg0: i32, %arg1: i32, %arg2: i32) -> (i32, i32, i32) {
    %c0_i32 = arith.constant 0 : i32
    %c0_i32_0 = arith.constant 0 : i32
    %c0_i32_1 = arith.constant 0 : i32
    return %arg0, %c0_i32, %c0_i32_0 : i32, i32, i32
  }
  func.func @transform_3(%arg0: i32, %arg1: i32, %arg2: i32) -> (i32, i32, i32) {
    %c0_i32 = arith.constant 0 : i32
    %c0_i32_0 = arith.constant 0 : i32
    %c0_i32_1 = arith.constant 0 : i32
    return %arg0, %c0_i32, %c0_i32_0 : i32, i32, i32
  }
  func.func @transform_4(%arg0: i32, %arg1: i32, %arg2: i32) -> (i32, i32, i32) {
    %c0_i32 = arith.constant 0 : i32
    %c0_i32_0 = arith.constant 0 : i32
    %c0_i32_1 = arith.constant 0 : i32
    return %arg0, %c0_i32, %c0_i32_0 : i32, i32, i32
  }
  func.func @transform_5(%arg0: i32, %arg1: i32, %arg2: i32) -> (i32, i32) {
    %c0_i32 = arith.constant 0 : i32
    %c0_i32_0 = arith.constant 0 : i32
    return %arg1, %c0_i32 : i32, i32
  }
  func.func @transform_6(%arg0: i32, %arg1: i32, %arg2: i32) -> (i32, i32, i32) {
    %c0_i32 = arith.constant 0 : i32
    %c0_i32_0 = arith.constant 0 : i32
    %c0_i32_1 = arith.constant 0 : i32
    return %arg2, %c0_i32, %c0_i32_0 : i32, i32, i32
  }
  func.func @transform_7(%arg0: i32, %arg1: i32, %arg2: i32) -> (i32, i32, i32) {
    %c0_i32 = arith.constant 0 : i32
    %c0_i32_0 = arith.constant 0 : i32
    %c0_i32_1 = arith.constant 0 : i32
    return %arg2, %c0_i32, %c0_i32_0 : i32, i32, i32
  }
  func.func @transform_8(%arg0: i32, %arg1: i32, %arg2: i32) -> (i32, i32, i32) {
    %c0_i32 = arith.constant 0 : i32
    %c0_i32_0 = arith.constant 0 : i32
    %c0_i32_1 = arith.constant 0 : i32
    return %arg2, %c0_i32, %c0_i32_0 : i32, i32, i32
  }
  func.func @transform_9(%arg0: i32, %arg1: i32, %arg2: i32) -> (i32, i32, i32) {
    %c0_i32 = arith.constant 0 : i32
    %c0_i32_0 = arith.constant 0 : i32
    %c0_i32_1 = arith.constant 0 : i32
    return %arg2, %c0_i32, %c0_i32_0 : i32, i32, i32
  }
  func.func @transform_10(%arg0: i32, %arg1: i32, %arg2: i32) -> (i32, i32, i32) {
    %c0_i32 = arith.constant 0 : i32
    %c0_i32_0 = arith.constant 0 : i32
    %c0_i32_1 = arith.constant 0 : i32
    return %arg2, %c0_i32, %c0_i32_0 : i32, i32, i32
  }
  func.func @transform_11(%arg0: i32, %arg1: i32, %arg2: i32) -> (i32, i32, i32) {
    %c0_i32 = arith.constant 0 : i32
    %c0_i32_0 = arith.constant 0 : i32
    %c0_i32_1 = arith.constant 0 : i32
    return %arg2, %c0_i32, %c0_i32_0 : i32, i32, i32
  }
  func.func @transform_12(%arg0: i32, %arg1: i32, %arg2: i32) -> (i32, i32, i32) {
    %c0_i32 = arith.constant 0 : i32
    %c0_i32_0 = arith.constant 0 : i32
    %c0_i32_1 = arith.constant 0 : i32
    return %arg2, %c0_i32, %c0_i32_0 : i32, i32, i32
  }
  func.func @transform_13(%arg0: i32, %arg1: i32, %arg2: i32) -> (i32, i32) {
    %c0_i32 = arith.constant 0 : i32
    %c0_i32_0 = arith.constant 0 : i32
    %c0_i32_1 = arith.constant 0 : i32
    return %c0_i32, %c0_i32_0 : i32, i32
  }
  func.func @transform_14(%arg0: i32, %arg1: i32, %arg2: i32) -> (i32, i32) {
    %c0_i32 = arith.constant 0 : i32
    %c0_i32_0 = arith.constant 0 : i32
    %c0_i32_1 = arith.constant 0 : i32
    return %c0_i32, %c0_i32_0 : i32, i32
  }
  func.func @transform_15(%arg0: i32, %arg1: i32, %arg2: i32) -> (i32, i32) {
    %c0_i32 = arith.constant 0 : i32
    %c0_i32_0 = arith.constant 0 : i32
    %c0_i32_1 = arith.constant 0 : i32
    return %c0_i32, %c0_i32_0 : i32, i32
  }
  func.func @transform_16(%arg0: i32, %arg1: i32, %arg2: i32) -> (i32, i32, i32) {
    %c0_i32 = arith.constant 0 : i32
    %c0_i32_0 = arith.constant 0 : i32
    return %arg0, %arg1, %c0_i32 : i32, i32, i32
  }
}

module attributes {stable_mosaic.version = 11 : i64} {
  func.func @fused_attn_kernel(%arg0: i32, %arg1: i32, %arg2: i32, %arg3: memref<1x8x32xf32, #tpu.memory_space<vmem>>, %arg4: memref<1x8x32xf32, #tpu.memory_space<vmem>>, %arg5: memref<1x12x32xf32, #tpu.memory_space<vmem>>, %arg6: memref<1x12x32xf32, #tpu.memory_space<vmem>>, %arg7: memref<1x1x12xf32, #tpu.memory_space<vmem>>, %arg8: memref<1x32x8xbf16, #tpu.memory_space<vmem>>, %arg9: memref<1x32x8xbf16, #tpu.memory_space<vmem>>, %arg10: memref<1x32x8xbf16, #tpu.memory_space<vmem>>, %arg11: memref<1x1x8xf32, #tpu.memory_space<vmem>>, %arg12: memref<1x1x8xf32, #tpu.memory_space<vmem>>, %arg13: memref<1x1x8xf32, #tpu.memory_space<vmem>>, %arg14: memref<1x8x32xbf16, #tpu.memory_space<vmem>>, %arg15: memref<1x32xf32, #tpu.memory_space<vmem>>, %arg16: memref<1x32xf32, #tpu.memory_space<vmem>>, %arg17: memref<1x32xf32, #tpu.memory_space<vmem>>, %arg18: memref<1x8x32xf32, #tpu.memory_space<vmem>>, %arg19: memref<1x8x12xf32, #tpu.memory_space<vmem>>, %arg20: memref<8x32xf32, #tpu.memory_space<vmem>>, %arg21: memref<8x12xf32, #tpu.memory_space<vmem>>) attributes {dimension_semantics = [#tpu.dimension_semantics<parallel>, #tpu.dimension_semantics<parallel>, #tpu.dimension_semantics<arbitrary>], iteration_bounds = array<i64: 2, 1, 4>, scalar_prefetch = 0 : i64, scratch_operands = 2 : i64, tpu.core_type = #tpu.core_type<tc>, window_params = [{transform_indices = @transform_0, window_bounds = array<i64: 1, 8, 32>}, {transform_indices = @transform_1, window_bounds = array<i64: 1, 8, 32>}, {transform_indices = @transform_2, window_bounds = array<i64: 1, 12, 32>}, {transform_indices = @transform_3, window_bounds = array<i64: 1, 12, 32>}, {transform_indices = @transform_4, window_bounds = array<i64: 1, 1, 12>}, {transform_indices = @transform_5, window_bounds = array<i64: 1, 32, 8>}, {transform_indices = @transform_6, window_bounds = array<i64: 1, 32, 8>}, {transform_indices = @transform_7, window_bounds = array<i64: 1, 32, 8>}, {transform_indices = @transform_8, window_bounds = array<i64: 1, 1, 8>}, {transform_indices = @transform_9, window_bounds = array<i64: 1, 1, 8>}, {transform_indices = @transform_10, window_bounds = array<i64: 1, 1, 8>}, {transform_indices = @transform_11, window_bounds = array<i64: 1, 8, 32>}, {pipeline_mode = #tpu.pipeline_mode<synchronous>, transform_indices = @transform_12, window_bounds = array<i64: 1, 32>}, {pipeline_mode = #tpu.pipeline_mode<synchronous>, transform_indices = @transform_13, window_bounds = array<i64: 1, 32>}, {pipeline_mode = #tpu.pipeline_mode<synchronous>, transform_indices = @transform_14, window_bounds = array<i64: 1, 32>}, {transform_indices = @transform_15, window_bounds = array<i64: 1, 8, 32>}, {transform_indices = @transform_16, window_bounds = array<i64: 1, 8, 12>}]} {
    %c0_i32 = arith.constant 0 : i32
    %0 = arith.cmpi eq, %arg2, %c0_i32 : i32
    %1 = arith.extui %0 : i1 to i32
    %c0_i32_0 = arith.constant 0 : i32
    %2 = arith.cmpi ne, %1, %c0_i32_0 : i32
    scf.if %2 {
      %cst_59 = arith.constant 0.000000e+00 : f32
      %80 = vector.broadcast %cst_59 : f32 to vector<8x32xf32>
      %c0_60 = arith.constant 0 : index
      %c0_61 = arith.constant 0 : index
      %81 = vector.load %arg20[%c0_60, %c0_61] : memref<8x32xf32, #tpu.memory_space<vmem>>, vector<8x32xf32>
      tpu.vector_store %arg20[%c0_60, %c0_61], %80 {strides = array<i32>} : memref<8x32xf32, #tpu.memory_space<vmem>>, vector<8x32xf32>,
      %cst_62 = arith.constant 0.000000e+00 : f32
      %82 = vector.broadcast %cst_62 : f32 to vector<8x12xf32>
      %c0_63 = arith.constant 0 : index
      %c0_64 = arith.constant 0 : index
      %83 = vector.load %arg21[%c0_63, %c0_64] : memref<8x12xf32, #tpu.memory_space<vmem>>, vector<8x12xf32>
      tpu.vector_store %arg21[%c0_63, %c0_64], %82 {strides = array<i32>} : memref<8x12xf32, #tpu.memory_space<vmem>>, vector<8x12xf32>,
    } else {
    }
    %c0 = arith.constant 0 : index
    %c0_1 = arith.constant 0 : index
    %c0_2 = arith.constant 0 : index
    %3 = vector.load %arg3[%c0, %c0_1, %c0_2] : memref<1x8x32xf32, #tpu.memory_space<vmem>>, vector<1x8x32xf32>
    %4 = vector.shape_cast %3 : vector<1x8x32xf32> to vector<8x32xf32>
    %c0_3 = arith.constant 0 : index
    %c0_4 = arith.constant 0 : index
    %c0_5 = arith.constant 0 : index
    %5 = vector.load %arg4[%c0_3, %c0_4, %c0_5] : memref<1x8x32xf32, #tpu.memory_space<vmem>>, vector<1x8x32xf32>
    %6 = vector.shape_cast %5 : vector<1x8x32xf32> to vector<8x32xf32>
    %7 = arith.addf %4, %6 : vector<8x32xf32>
    %8 = arith.truncf %7 : vector<8x32xf32> to vector<8x32xbf16>
    %c0_6 = arith.constant 0 : index
    %c0_7 = arith.constant 0 : index
    %c0_8 = arith.constant 0 : index
    %9 = vector.load %arg5[%c0_6, %c0_7, %c0_8] : memref<1x12x32xf32, #tpu.memory_space<vmem>>, vector<1x12x32xf32>
    %10 = vector.shape_cast %9 : vector<1x12x32xf32> to vector<12x32xf32>
    %c0_9 = arith.constant 0 : index
    %c0_10 = arith.constant 0 : index
    %c0_11 = arith.constant 0 : index
    %11 = vector.load %arg6[%c0_9, %c0_10, %c0_11] : memref<1x12x32xf32, #tpu.memory_space<vmem>>, vector<1x12x32xf32>
    %12 = vector.shape_cast %11 : vector<1x12x32xf32> to vector<12x32xf32>
    %13 = arith.addf %10, %12 : vector<12x32xf32>
    %14 = arith.truncf %13 : vector<12x32xf32> to vector<12x32xbf16>
    %c0_12 = arith.constant 0 : index
    %c0_13 = arith.constant 0 : index
    %c0_14 = arith.constant 0 : index
    %15 = vector.load %arg5[%c0_12, %c0_13, %c0_14] : memref<1x12x32xf32, #tpu.memory_space<vmem>>, vector<1x12x32xf32>
    %16 = vector.shape_cast %15 : vector<1x12x32xf32> to vector<12x32xf32>
    %17 = arith.truncf %16 : vector<12x32xf32> to vector<12x32xbf16>
    %c0_15 = arith.constant 0 : index
    %c0_16 = arith.constant 0 : index
    %c0_17 = arith.constant 0 : index
    %18 = vector.load %arg8[%c0_15, %c0_16, %c0_17] : memref<1x32x8xbf16, #tpu.memory_space<vmem>>, vector<1x32x8xbf16>
    %19 = vector.shape_cast %18 : vector<1x32x8xbf16> to vector<32x8xbf16>
    %cst = arith.constant dense<0.000000e+00> : vector<8x8xf32>
    %20 = tpu.matmul %8, %19, %cst {dimension_numbers = #tpu.dot_dimension_numbers<[1], [0], [0], [1], [0, 0, 1, 1], [], []>} : vector<8x32xbf16>, vector<32x8xbf16>, vector<8x8xf32> -> vector<8x8xf32>
    %c0_18 = arith.constant 0 : index
    %c0_19 = arith.constant 0 : index
    %c0_20 = arith.constant 0 : index
    %21 = vector.load %arg11[%c0_18, %c0_19, %c0_20] : memref<1x1x8xf32, #tpu.memory_space<vmem>>, vector<1x1x8xf32>
    %22 = vector.shape_cast %21 : vector<1x1x8xf32> to vector<1x8xf32>
    %23 = vector.broadcast %22 : vector<1x8xf32> to vector<8x8xf32>
    %24 = arith.addf %20, %23 : vector<8x8xf32>
    %c0_21 = arith.constant 0 : index
    %c0_22 = arith.constant 0 : index
    %c0_23 = arith.constant 0 : index
    %25 = vector.load %arg9[%c0_21, %c0_22, %c0_23] : memref<1x32x8xbf16, #tpu.memory_space<vmem>>, vector<1x32x8xbf16>
    %26 = vector.shape_cast %25 : vector<1x32x8xbf16> to vector<32x8xbf16>
    %cst_24 = arith.constant dense<0.000000e+00> : vector<12x8xf32>
    %27 = tpu.matmul %14, %26, %cst_24 {dimension_numbers = #tpu.dot_dimension_numbers<[1], [0], [0], [1], [0, 0, 1, 1], [], []>} : vector<12x32xbf16>, vector<32x8xbf16>, vector<12x8xf32> -> vector<12x8xf32>
    %c0_25 = arith.constant 0 : index
    %c0_26 = arith.constant 0 : index
    %c0_27 = arith.constant 0 : index
    %28 = vector.load %arg12[%c0_25, %c0_26, %c0_27] : memref<1x1x8xf32, #tpu.memory_space<vmem>>, vector<1x1x8xf32>
    %29 = vector.shape_cast %28 : vector<1x1x8xf32> to vector<1x8xf32>
    %30 = vector.broadcast %29 : vector<1x8xf32> to vector<12x8xf32>
    %31 = arith.addf %27, %30 : vector<12x8xf32>
    %c0_28 = arith.constant 0 : index
    %c0_29 = arith.constant 0 : index
    %c0_30 = arith.constant 0 : index
    %32 = vector.load %arg10[%c0_28, %c0_29, %c0_30] : memref<1x32x8xbf16, #tpu.memory_space<vmem>>, vector<1x32x8xbf16>
    %33 = vector.shape_cast %32 : vector<1x32x8xbf16> to vector<32x8xbf16>
    %cst_31 = arith.constant dense<0.000000e+00> : vector<12x8xf32>
    %34 = tpu.matmul %17, %33, %cst_31 {dimension_numbers = #tpu.dot_dimension_numbers<[1], [0], [0], [1], [0, 0, 1, 1], [], []>} : vector<12x32xbf16>, vector<32x8xbf16>, vector<12x8xf32> -> vector<12x8xf32>
    %c0_32 = arith.constant 0 : index
    %c0_33 = arith.constant 0 : index
    %c0_34 = arith.constant 0 : index
    %35 = vector.load %arg13[%c0_32, %c0_33, %c0_34] : memref<1x1x8xf32, #tpu.memory_space<vmem>>, vector<1x1x8xf32>
    %36 = vector.shape_cast %35 : vector<1x1x8xf32> to vector<1x8xf32>
    %37 = vector.broadcast %36 : vector<1x8xf32> to vector<12x8xf32>
    %38 = arith.addf %34, %37 : vector<12x8xf32>
    %c0_35 = arith.constant 0 : index
    %c0_36 = arith.constant 0 : index
    %c0_37 = arith.constant 0 : index
    %39 = vector.load %arg7[%c0_35, %c0_36, %c0_37] : memref<1x1x12xf32, #tpu.memory_space<vmem>>, vector<1x1x12xf32>
    %40 = vector.shape_cast %39 : vector<1x1x12xf32> to vector<1x12xf32>
    %cst_38 = arith.constant 5.000000e-01 : f32
    %41 = vector.broadcast %cst_38 : f32 to vector<1x12xf32>
    %42 = arith.cmpf ogt, %40, %41 : vector<1x12xf32>
    %cst_39 = arith.constant -1.000000e+30 : f32
    %cst_40 = arith.constant 0.000000e+00 : f32
    %43 = vector.broadcast %cst_39 : f32 to vector<1x12xf32>
    %44 = vector.broadcast %cst_40 : f32 to vector<1x12xf32>
    %45 = arith.select %42, %43, %44 : vector<1x12xi1>, vector<1x12xf32>
    %46 = arith.truncf %24 : vector<8x8xf32> to vector<8x8xbf16>
    %47 = tpu.transpose %31, [1, 0] : vector<12x8xf32> -> vector<8x12xf32>
    %48 = arith.truncf %47 : vector<8x12xf32> to vector<8x12xbf16>
    %cst_41 = arith.constant dense<0.000000e+00> : vector<8x12xf32>
    %49 = tpu.matmul %46, %48, %cst_41 {dimension_numbers = #tpu.dot_dimension_numbers<[1], [0], [0], [1], [0, 0, 1, 1], [], []>} : vector<8x8xbf16>, vector<8x12xbf16>, vector<8x12xf32> -> vector<8x12xf32>
    %cst_42 = arith.constant 0.353553385 : f32
    %50 = vector.broadcast %cst_42 : f32 to vector<8x12xf32>
    %51 = arith.mulf %49, %50 : vector<8x12xf32>
    %52 = vector.broadcast %45 : vector<1x12xf32> to vector<8x12xf32>
    %53 = arith.addf %51, %52 : vector<8x12xf32>
    %cst_43 = arith.constant dense<0xFF800000> : vector<8xf32>
    %54 = vector.multi_reduction <maximumf>, %53, %cst_43 [1] : vector<8x12xf32> to vector<8xf32>
    %55 = vector.shape_cast %54 : vector<8xf32> to vector<8x1xf32>
    %56 = vector.broadcast %55 : vector<8x1xf32> to vector<8x12xf32>
    %57 = arith.subf %53, %56 : vector<8x12xf32>
    %58 = math.exp %57 : vector<8x12xf32>
    %cst_44 = arith.constant dense<0.000000e+00> : vector<8xf32>
    %59 = vector.multi_reduction <add>, %58, %cst_44 [1] : vector<8x12xf32> to vector<8xf32>
    %60 = vector.shape_cast %59 : vector<8xf32> to vector<8x1xf32>
    %61 = tpu.reciprocal %60 {approx = true} : vector<8x1xf32> -> vector<8x1xf32>
    %62 = vector.broadcast %61 : vector<8x1xf32> to vector<8x12xf32>
    %63 = arith.mulf %58, %62 : vector<8x12xf32>
    %64 = arith.truncf %63 : vector<8x12xf32> to vector<8x12xbf16>
    %65 = arith.truncf %38 : vector<12x8xf32> to vector<12x8xbf16>
    %cst_45 = arith.constant dense<0.000000e+00> : vector<8x8xf32>
    %66 = tpu.matmul %64, %65, %cst_45 {dimension_numbers = #tpu.dot_dimension_numbers<[1], [0], [0], [1], [0, 0, 1, 1], [], []>} : vector<8x12xbf16>, vector<12x8xbf16>, vector<8x8xf32> -> vector<8x8xf32>
    %c0_46 = arith.constant 0 : index
    %c0_47 = arith.constant 0 : index
    %67 = vector.load %arg20[%c0_46, %c0_47] : memref<8x32xf32, #tpu.memory_space<vmem>>, vector<8x32xf32>
    %68 = arith.truncf %66 : vector<8x8xf32> to vector<8x8xbf16>
    %c0_48 = arith.constant 0 : index
    %c0_49 = arith.constant 0 : index
    %c0_50 = arith.constant 0 : index
    %69 = vector.load %arg14[%c0_48, %c0_49, %c0_50] : memref<1x8x32xbf16, #tpu.memory_space<vmem>>, vector<1x8x32xbf16>
    %70 = vector.shape_cast %69 : vector<1x8x32xbf16> to vector<8x32xbf16>
    %cst_51 = arith.constant dense<0.000000e+00> : vector<8x32xf32>
    %71 = tpu.matmul %68, %70, %cst_51 {dimension_numbers = #tpu.dot_dimension_numbers<[1], [0], [0], [1], [0, 0, 1, 1], [], []>} : vector<8x8xbf16>, vector<8x32xbf16>, vector<8x32xf32> -> vector<8x32xf32>
    %72 = arith.addf %67, %71 : vector<8x32xf32>
    %c0_52 = arith.constant 0 : index
    %c0_53 = arith.constant 0 : index
    %73 = vector.load %arg20[%c0_52, %c0_53] : memref<8x32xf32, #tpu.memory_space<vmem>>, vector<8x32xf32>
    tpu.vector_store %arg20[%c0_52, %c0_53], %72 {strides = array<i32>} : memref<8x32xf32, #tpu.memory_space<vmem>>, vector<8x32xf32>,
    %c0_54 = arith.constant 0 : index
    %c0_55 = arith.constant 0 : index
    %74 = vector.load %arg21[%c0_54, %c0_55] : memref<8x12xf32, #tpu.memory_space<vmem>>, vector<8x12xf32>
    %75 = arith.addf %74, %63 : vector<8x12xf32>
    %c0_56 = arith.constant 0 : index
    %c0_57 = arith.constant 0 : index
    %76 = vector.load %arg21[%c0_56, %c0_57] : memref<8x12xf32, #tpu.memory_space<vmem>>, vector<8x12xf32>
    tpu.vector_store %arg21[%c0_56, %c0_57], %75 {strides = array<i32>} : memref<8x12xf32, #tpu.memory_space<vmem>>, vector<8x12xf32>,
    %c3_i32 = arith.constant 3 : i32
    %77 = arith.cmpi eq, %arg2, %c3_i32 : i32
    %78 = arith.extui %77 : i1 to i32
    %c0_i32_58 = arith.constant 0 : i32
    %79 = arith.cmpi ne, %78, %c0_i32_58 : i32
    scf.if %79 {
      %c0_59 = arith.constant 0 : index
      %c0_60 = arith.constant 0 : index
      %80 = vector.load %arg20[%c0_59, %c0_60] : memref<8x32xf32, #tpu.memory_space<vmem>>, vector<8x32xf32>
      %81 = arith.addf %4, %80 : vector<8x32xf32>
      %c0_61 = arith.constant 0 : index
      %c0_62 = arith.constant 0 : index
      %82 = vector.load %arg15[%c0_61, %c0_62] : memref<1x32xf32, #tpu.memory_space<vmem>>, vector<1x32xf32>
      %83 = vector.broadcast %82 : vector<1x32xf32> to vector<8x32xf32>
      %84 = arith.addf %81, %83 : vector<8x32xf32>
      %c0_63 = arith.constant 0 : index
      %c0_64 = arith.constant 0 : index
      %85 = vector.load %arg16[%c0_63, %c0_64] : memref<1x32xf32, #tpu.memory_space<vmem>>, vector<1x32xf32>
      %c0_65 = arith.constant 0 : index
      %c0_66 = arith.constant 0 : index
      %86 = vector.load %arg17[%c0_65, %c0_66] : memref<1x32xf32, #tpu.memory_space<vmem>>, vector<1x32xf32>
      %cst_67 = arith.constant dense<0.000000e+00> : vector<8xf32>
      %87 = vector.multi_reduction <add>, %84, %cst_67 [1] : vector<8x32xf32> to vector<8xf32>
      %88 = vector.shape_cast %87 : vector<8xf32> to vector<8x1xf32>
      %cst_68 = arith.constant 3.200000e+01 : f32
      %89 = vector.broadcast %cst_68 : f32 to vector<8x1xf32>
      %90 = arith.divf %88, %89 : vector<8x1xf32>
      %91 = vector.broadcast %90 : vector<8x1xf32> to vector<8x32xf32>
      %92 = arith.subf %84, %91 : vector<8x32xf32>
      %93 = arith.mulf %92, %92 : vector<8x32xf32>
      %cst_69 = arith.constant dense<0.000000e+00> : vector<8xf32>
      %94 = vector.multi_reduction <add>, %93, %cst_69 [1] : vector<8x32xf32> to vector<8xf32>
      %95 = vector.shape_cast %94 : vector<8xf32> to vector<8x1xf32>
      %cst_70 = arith.constant 3.200000e+01 : f32
      %96 = vector.broadcast %cst_70 : f32 to vector<8x1xf32>
      %97 = arith.divf %95, %96 : vector<8x1xf32>
      %98 = vector.broadcast %90 : vector<8x1xf32> to vector<8x32xf32>
      %99 = arith.subf %84, %98 : vector<8x32xf32>
      %cst_71 = arith.constant 9.99999974E-6 : f32
      %100 = vector.broadcast %cst_71 : f32 to vector<8x1xf32>
      %101 = arith.addf %97, %100 : vector<8x1xf32>
      %102 = math.rsqrt %101 : vector<8x1xf32>
      %103 = vector.broadcast %102 : vector<8x1xf32> to vector<8x32xf32>
      %104 = arith.mulf %99, %103 : vector<8x32xf32>
      %105 = vector.broadcast %85 : vector<1x32xf32> to vector<8x32xf32>
      %106 = arith.mulf %104, %105 : vector<8x32xf32>
      %107 = vector.broadcast %86 : vector<1x32xf32> to vector<8x32xf32>
      %108 = arith.addf %106, %107 : vector<8x32xf32>
      %c0_72 = arith.constant 0 : index
      %c0_73 = arith.constant 0 : index
      %c0_74 = arith.constant 0 : index
      %109 = vector.load %arg18[%c0_72, %c0_73, %c0_74] : memref<1x8x32xf32, #tpu.memory_space<vmem>>, vector<1x8x32xf32>
      %110 = vector.shape_cast %109 : vector<1x8x32xf32> to vector<8x32xf32>
      %111 = vector.shape_cast %108 : vector<8x32xf32> to vector<1x8x32xf32>
      tpu.vector_store %arg18[%c0_72, %c0_73, %c0_74], %111 {strides = array<i32>} : memref<1x8x32xf32, #tpu.memory_space<vmem>>, vector<1x8x32xf32>,
      %c0_75 = arith.constant 0 : index
      %c0_76 = arith.constant 0 : index
      %112 = vector.load %arg21[%c0_75, %c0_76] : memref<8x12xf32, #tpu.memory_space<vmem>>, vector<8x12xf32>
      %cst_77 = arith.constant 2.500000e-01 : f32
      %113 = vector.broadcast %cst_77 : f32 to vector<8x12xf32>
      %114 = arith.mulf %112, %113 : vector<8x12xf32>
      %c0_78 = arith.constant 0 : index
      %c0_79 = arith.constant 0 : index
      %c0_80 = arith.constant 0 : index
      %115 = vector.load %arg19[%c0_78, %c0_79, %c0_80] : memref<1x8x12xf32, #tpu.memory_space<vmem>>, vector<1x8x12xf32>
      %116 = vector.shape_cast %115 : vector<1x8x12xf32> to vector<8x12xf32>
      %117 = vector.shape_cast %114 : vector<8x12xf32> to vector<1x8x12xf32>
      tpu.vector_store %arg19[%c0_78, %c0_79, %c0_80], %117 {strides = array<i32>} : memref<1x8x12xf32, #tpu.memory_space<vmem>>, vector<1x8x12xf32>,
    } else {
    }
    return
  }
  func.func @transform_0(%arg0: i32, %arg1: i32, %arg2: i32) -> (i32, i32, i32) {
    %c0_i32 = arith.constant 0 : i32
    %c0_i32_0 = arith.constant 0 : i32
    return %arg0, %arg1, %c0_i32 : i32, i32, i32
  }
  func.func @transform_1(%arg0: i32, %arg1: i32, %arg2: i32) -> (i32, i32, i32) {
    %c0_i32 = arith.constant 0 : i32
    %c0_i32_0 = arith.constant 0 : i32
    return %arg0, %arg1, %c0_i32 : i32, i32, i32
  }
  func.func @transform_2(%arg0: i32, %arg1: i32, %arg2: i32) -> (i32, i32, i32) {
    %c0_i32 = arith.constant 0 : i32
    %c0_i32_0 = arith.constant 0 : i32
    %c0_i32_1 = arith.constant 0 : i32
    return %arg0, %c0_i32, %c0_i32_0 : i32, i32, i32
  }
  func.func @transform_3(%arg0: i32, %arg1: i32, %arg2: i32) -> (i32, i32, i32) {
    %c0_i32 = arith.constant 0 : i32
    %c0_i32_0 = arith.constant 0 : i32
    %c0_i32_1 = arith.constant 0 : i32
    return %arg0, %c0_i32, %c0_i32_0 : i32, i32, i32
  }
  func.func @transform_4(%arg0: i32, %arg1: i32, %arg2: i32) -> (i32, i32, i32) {
    %c0_i32 = arith.constant 0 : i32
    %c0_i32_0 = arith.constant 0 : i32
    %c0_i32_1 = arith.constant 0 : i32
    return %arg0, %c0_i32, %c0_i32_0 : i32, i32, i32
  }
  func.func @transform_5(%arg0: i32, %arg1: i32, %arg2: i32) -> (i32, i32, i32) {
    %c0_i32 = arith.constant 0 : i32
    %c0_i32_0 = arith.constant 0 : i32
    %c0_i32_1 = arith.constant 0 : i32
    return %arg2, %c0_i32, %c0_i32_0 : i32, i32, i32
  }
  func.func @transform_6(%arg0: i32, %arg1: i32, %arg2: i32) -> (i32, i32, i32) {
    %c0_i32 = arith.constant 0 : i32
    %c0_i32_0 = arith.constant 0 : i32
    %c0_i32_1 = arith.constant 0 : i32
    return %arg2, %c0_i32, %c0_i32_0 : i32, i32, i32
  }
  func.func @transform_7(%arg0: i32, %arg1: i32, %arg2: i32) -> (i32, i32, i32) {
    %c0_i32 = arith.constant 0 : i32
    %c0_i32_0 = arith.constant 0 : i32
    %c0_i32_1 = arith.constant 0 : i32
    return %arg2, %c0_i32, %c0_i32_0 : i32, i32, i32
  }
  func.func @transform_8(%arg0: i32, %arg1: i32, %arg2: i32) -> (i32, i32, i32) {
    %c0_i32 = arith.constant 0 : i32
    %c0_i32_0 = arith.constant 0 : i32
    %c0_i32_1 = arith.constant 0 : i32
    return %arg2, %c0_i32, %c0_i32_0 : i32, i32, i32
  }
  func.func @transform_9(%arg0: i32, %arg1: i32, %arg2: i32) -> (i32, i32, i32) {
    %c0_i32 = arith.constant 0 : i32
    %c0_i32_0 = arith.constant 0 : i32
    %c0_i32_1 = arith.constant 0 : i32
    return %arg2, %c0_i32, %c0_i32_0 : i32, i32, i32
  }
  func.func @transform_10(%arg0: i32, %arg1: i32, %arg2: i32) -> (i32, i32, i32) {
    %c0_i32 = arith.constant 0 : i32
    %c0_i32_0 = arith.constant 0 : i32
    %c0_i32_1 = arith.constant 0 : i32
    return %arg2, %c0_i32, %c0_i32_0 : i32, i32, i32
  }
  func.func @transform_11(%arg0: i32, %arg1: i32, %arg2: i32) -> (i32, i32, i32) {
    %c0_i32 = arith.constant 0 : i32
    %c0_i32_0 = arith.constant 0 : i32
    %c0_i32_1 = arith.constant 0 : i32
    return %arg2, %c0_i32, %c0_i32_0 : i32, i32, i32
  }
  func.func @transform_12(%arg0: i32, %arg1: i32, %arg2: i32) -> (i32, i32) {
    %c0_i32 = arith.constant 0 : i32
    %c0_i32_0 = arith.constant 0 : i32
    %c0_i32_1 = arith.constant 0 : i32
    return %c0_i32, %c0_i32_0 : i32, i32
  }
  func.func @transform_13(%arg0: i32, %arg1: i32, %arg2: i32) -> (i32, i32) {
    %c0_i32 = arith.constant 0 : i32
    %c0_i32_0 = arith.constant 0 : i32
    %c0_i32_1 = arith.constant 0 : i32
    return %c0_i32, %c0_i32_0 : i32, i32
  }
  func.func @transform_14(%arg0: i32, %arg1: i32, %arg2: i32) -> (i32, i32) {
    %c0_i32 = arith.constant 0 : i32
    %c0_i32_0 = arith.constant 0 : i32
    %c0_i32_1 = arith.constant 0 : i32
    return %c0_i32, %c0_i32_0 : i32, i32
  }
  func.func @transform_15(%arg0: i32, %arg1: i32, %arg2: i32) -> (i32, i32, i32) {
    %c0_i32 = arith.constant 0 : i32
    %c0_i32_0 = arith.constant 0 : i32
    return %arg0, %arg1, %c0_i32 : i32, i32, i32
  }
  func.func @transform_16(%arg0: i32, %arg1: i32, %arg2: i32) -> (i32, i32, i32) {
    %c0_i32 = arith.constant 0 : i32
    %c0_i32_0 = arith.constant 0 : i32
    return %arg0, %arg1, %c0_i32 : i32, i32, i32
  }
}

module attributes {stable_mosaic.version = 11 : i64} {
  func.func @fused_ffn_kernel(%arg0: i32, %arg1: memref<8x32xf32, #tpu.memory_space<vmem>>, %arg2: memref<32x64xbf16, #tpu.memory_space<vmem>>, %arg3: memref<1x64xf32, #tpu.memory_space<vmem>>, %arg4: memref<64x32xbf16, #tpu.memory_space<vmem>>, %arg5: memref<1x32xf32, #tpu.memory_space<vmem>>, %arg6: memref<1x32xf32, #tpu.memory_space<vmem>>, %arg7: memref<1x32xf32, #tpu.memory_space<vmem>>, %arg8: memref<8x32xf32, #tpu.memory_space<vmem>>) attributes {dimension_semantics = [#tpu.dimension_semantics<parallel>], iteration_bounds = array<i64: 2>, scalar_prefetch = 0 : i64, scratch_operands = 0 : i64, tpu.core_type = #tpu.core_type<tc>, window_params = [{transform_indices = @transform_0, window_bounds = array<i64: 8, 32>}, {pipeline_mode = #tpu.pipeline_mode<synchronous>, transform_indices = @transform_1, window_bounds = array<i64: 32, 64>}, {pipeline_mode = #tpu.pipeline_mode<synchronous>, transform_indices = @transform_2, window_bounds = array<i64: 1, 64>}, {pipeline_mode = #tpu.pipeline_mode<synchronous>, transform_indices = @transform_3, window_bounds = array<i64: 64, 32>}, {pipeline_mode = #tpu.pipeline_mode<synchronous>, transform_indices = @transform_4, window_bounds = array<i64: 1, 32>}, {pipeline_mode = #tpu.pipeline_mode<synchronous>, transform_indices = @transform_5, window_bounds = array<i64: 1, 32>}, {pipeline_mode = #tpu.pipeline_mode<synchronous>, transform_indices = @transform_6, window_bounds = array<i64: 1, 32>}, {transform_indices = @transform_7, window_bounds = array<i64: 8, 32>}]} {
    %c0 = arith.constant 0 : index
    %c0_0 = arith.constant 0 : index
    %0 = vector.load %arg1[%c0, %c0_0] : memref<8x32xf32, #tpu.memory_space<vmem>>, vector<8x32xf32>
    %1 = arith.truncf %0 : vector<8x32xf32> to vector<8x32xbf16>
    %c0_1 = arith.constant 0 : index
    %c0_2 = arith.constant 0 : index
    %2 = vector.load %arg2[%c0_1, %c0_2] : memref<32x64xbf16, #tpu.memory_space<vmem>>, vector<32x64xbf16>
    %cst = arith.constant dense<0.000000e+00> : vector<8x64xf32>
    %3 = tpu.matmul %1, %2, %cst {dimension_numbers = #tpu.dot_dimension_numbers<[1], [0], [0], [1], [0, 0, 1, 1], [], []>} : vector<8x32xbf16>, vector<32x64xbf16>, vector<8x64xf32> -> vector<8x64xf32>
    %c0_3 = arith.constant 0 : index
    %c0_4 = arith.constant 0 : index
    %4 = vector.load %arg3[%c0_3, %c0_4] : memref<1x64xf32, #tpu.memory_space<vmem>>, vector<1x64xf32>
    %5 = vector.broadcast %4 : vector<1x64xf32> to vector<8x64xf32>
    %6 = arith.addf %3, %5 : vector<8x64xf32>
    %cst_5 = arith.constant 0.000000e+00 : f32
    %7 = vector.broadcast %cst_5 : f32 to vector<8x64xf32>
    %8 = arith.maximumf %6, %7 : vector<8x64xf32>
    %9 = arith.truncf %8 : vector<8x64xf32> to vector<8x64xbf16>
    %c0_6 = arith.constant 0 : index
    %c0_7 = arith.constant 0 : index
    %10 = vector.load %arg4[%c0_6, %c0_7] : memref<64x32xbf16, #tpu.memory_space<vmem>>, vector<64x32xbf16>
    %cst_8 = arith.constant dense<0.000000e+00> : vector<8x32xf32>
    %11 = tpu.matmul %9, %10, %cst_8 {dimension_numbers = #tpu.dot_dimension_numbers<[1], [0], [0], [1], [0, 0, 1, 1], [], []>} : vector<8x64xbf16>, vector<64x32xbf16>, vector<8x32xf32> -> vector<8x32xf32>
    %c0_9 = arith.constant 0 : index
    %c0_10 = arith.constant 0 : index
    %12 = vector.load %arg5[%c0_9, %c0_10] : memref<1x32xf32, #tpu.memory_space<vmem>>, vector<1x32xf32>
    %13 = vector.broadcast %12 : vector<1x32xf32> to vector<8x32xf32>
    %14 = arith.addf %11, %13 : vector<8x32xf32>
    %15 = arith.addf %0, %14 : vector<8x32xf32>
    %c0_11 = arith.constant 0 : index
    %c0_12 = arith.constant 0 : index
    %16 = vector.load %arg6[%c0_11, %c0_12] : memref<1x32xf32, #tpu.memory_space<vmem>>, vector<1x32xf32>
    %c0_13 = arith.constant 0 : index
    %c0_14 = arith.constant 0 : index
    %17 = vector.load %arg7[%c0_13, %c0_14] : memref<1x32xf32, #tpu.memory_space<vmem>>, vector<1x32xf32>
    %cst_15 = arith.constant dense<0.000000e+00> : vector<8xf32>
    %18 = vector.multi_reduction <add>, %15, %cst_15 [1] : vector<8x32xf32> to vector<8xf32>
    %19 = vector.shape_cast %18 : vector<8xf32> to vector<8x1xf32>
    %cst_16 = arith.constant 3.200000e+01 : f32
    %20 = vector.broadcast %cst_16 : f32 to vector<8x1xf32>
    %21 = arith.divf %19, %20 : vector<8x1xf32>
    %22 = vector.broadcast %21 : vector<8x1xf32> to vector<8x32xf32>
    %23 = arith.subf %15, %22 : vector<8x32xf32>
    %24 = arith.mulf %23, %23 : vector<8x32xf32>
    %cst_17 = arith.constant dense<0.000000e+00> : vector<8xf32>
    %25 = vector.multi_reduction <add>, %24, %cst_17 [1] : vector<8x32xf32> to vector<8xf32>
    %26 = vector.shape_cast %25 : vector<8xf32> to vector<8x1xf32>
    %cst_18 = arith.constant 3.200000e+01 : f32
    %27 = vector.broadcast %cst_18 : f32 to vector<8x1xf32>
    %28 = arith.divf %26, %27 : vector<8x1xf32>
    %29 = vector.broadcast %21 : vector<8x1xf32> to vector<8x32xf32>
    %30 = arith.subf %15, %29 : vector<8x32xf32>
    %cst_19 = arith.constant 9.99999974E-6 : f32
    %31 = vector.broadcast %cst_19 : f32 to vector<8x1xf32>
    %32 = arith.addf %28, %31 : vector<8x1xf32>
    %33 = math.rsqrt %32 : vector<8x1xf32>
    %34 = vector.broadcast %33 : vector<8x1xf32> to vector<8x32xf32>
    %35 = arith.mulf %30, %34 : vector<8x32xf32>
    %36 = vector.broadcast %16 : vector<1x32xf32> to vector<8x32xf32>
    %37 = arith.mulf %35, %36 : vector<8x32xf32>
    %38 = vector.broadcast %17 : vector<1x32xf32> to vector<8x32xf32>
    %39 = arith.addf %37, %38 : vector<8x32xf32>
    %c0_20 = arith.constant 0 : index
    %c0_21 = arith.constant 0 : index
    %40 = vector.load %arg8[%c0_20, %c0_21] : memref<8x32xf32, #tpu.memory_space<vmem>>, vector<8x32xf32>
    tpu.vector_store %arg8[%c0_20, %c0_21], %39 {strides = array<i32>} : memref<8x32xf32, #tpu.memory_space<vmem>>, vector<8x32xf32>,
    return
  }
  func.func @transform_0(%arg0: i32) -> (i32, i32) {
    %c0_i32 = arith.constant 0 : i32
    %c0_i32_0 = arith.constant 0 : i32
    return %arg0, %c0_i32 : i32, i32
  }
  func.func @transform_1(%arg0: i32) -> (i32, i32) {
    %c0_i32 = arith.constant 0 : i32
    %c0_i32_0 = arith.constant 0 : i32
    %c0_i32_1 = arith.constant 0 : i32
    return %c0_i32, %c0_i32_0 : i32, i32
  }
  func.func @transform_2(%arg0: i32) -> (i32, i32) {
    %c0_i32 = arith.constant 0 : i32
    %c0_i32_0 = arith.constant 0 : i32
    %c0_i32_1 = arith.constant 0 : i32
    return %c0_i32, %c0_i32_0 : i32, i32
  }
  func.func @transform_3(%arg0: i32) -> (i32, i32) {
    %c0_i32 = arith.constant 0 : i32
    %c0_i32_0 = arith.constant 0 : i32
    %c0_i32_1 = arith.constant 0 : i32
    return %c0_i32, %c0_i32_0 : i32, i32
  }
  func.func @transform_4(%arg0: i32) -> (i32, i32) {
    %c0_i32 = arith.constant 0 : i32
    %c0_i32_0 = arith.constant 0 : i32
    %c0_i32_1 = arith.constant 0 : i32
    return %c0_i32, %c0_i32_0 : i32, i32
  }
  func.func @transform_5(%arg0: i32) -> (i32, i32) {
    %c0_i32 = arith.constant 0 : i32
    %c0_i32_0 = arith.constant 0 : i32
    %c0_i32_1 = arith.constant 0 : i32
    return %c0_i32, %c0_i32_0 : i32, i32
  }
  func.func @transform_6(%arg0: i32) -> (i32, i32) {
    %c0_i32 = arith.constant 0 : i32
    %c0_i32_0 = arith.constant 0 : i32
    %c0_i32_1 = arith.constant 0 : i32
    return %c0_i32, %c0_i32_0 : i32, i32
  }
  func.func @transform_7(%arg0: i32) -> (i32, i32) {
    %c0_i32 = arith.constant 0 : i32
    %c0_i32_0 = arith.constant 0 : i32
    return %arg0, %c0_i32 : i32, i32
  }
}

</mosaic_0001>

<bundles_post_ra>
// kernel: decoder_layer_forward.5
= control target key start
LH: loop header
LB: loop body
LE: loop exit
PB: predicated region body
PF: predicated region fallthrough
CT: control target
= control target key end

     0   :  { %s570_s24 = smov 0   ;;  %s628_s0 = inlined_call_operand.vmem [shape: f32[16,32], index: 0, kind: input, shape index: {}]   ;;  %s629_s1 = inlined_call_operand.vmem [shape: bf16[32,64], index: 1, kind: input, shape index: {}]   ;;  %s630_s2 = inlined_call_operand.vmem [shape: f32[1,64], index: 2, kind: input, shape index: {}]   ;;  %s631_s3 = inlined_call_operand.vmem [shape: bf16[64,32], index: 3, kind: input, shape index: {}]   ;;  %s632_s4 = inlined_call_operand.vmem [shape: f32[1,32], index: 4, kind: input, shape index: {}]   ;;  %s633_s5 = inlined_call_operand.vmem [shape: f32[1,32], index: 5, kind: input, shape index: {}]   ;;  %s634_s6 = inlined_call_operand.vmem [shape: f32[1,32], index: 6, kind: input, shape index: {}]   ;;  %s635_s7 = inlined_call_operand.vmem [shape: f32[16,32], index: 7, kind: output, shape index: {}]  }
   0x1 LB: > { %s463_s25 = sadd.s32 4294967295, %s527_s24   ;;  %p467_p0 = scmp.ge.s32.totalorder %s527_s24, 1  ;;  %s527_s24 = sphi %s570_s24, %s17_s24  }
   0x2   : > { %p236_p1 = scmp.lt.s32.totalorder %s527_s24, 3 }
   0x4   : > { %p237_p2 = pnand %p467_p0, %p236_p1 }
   0x5   : > { %p266_p3 = scmp.lt.s32.totalorder (!%p237_p2), %s463_s25, 1 }
   0x6   : > { %240 = sbr.rel (%p237_p2) target bundleno = 550 (0x226), region = 48 }
   0xb   : > { %v499_v0 = vld [vmem:[%s629_s1 + $0x8] sm:$0xff]  ;;  %v503_v1 = vld [vmem:[%s631_s3 + $0x18] sm:$0xff]  ;;  %v498_v2 = vld [vmem:[%s629_s1] sm:$0xff]  ;;  %s637_s25 = smov (!%p266_p3, %s463_s25), 1  ;;  %vm297_vm0 = vcmask 261120   ;;  %vm352_vm1 = vcmask 523264  }
   0xc   : > { %307 = vmatpush.bf16.msra.mxu0 %v499_v0  ;;  %360 = vmatpush.bf16.msra.mxu1 %v503_v1  ;;  %v502_v3 = vld [vmem:[%s631_s3 + $0x10] sm:$0xff]  ;;  %s468_s11 = sshll.u32 %s637_s25, 3  ;;  %v501_v6 = vld [vmem:[%s631_s3 + $0x8] sm:$0xff]  ;;  %v500_v7 = vld [vmem:[%s631_s3] sm:$0xff]  ;;  %v529_v20 = vmov 32.0  }
   0xd   : > { %s269_s14 = scalar_lea.vmem %s628_s0, %s468_s11  ;;  %v513_v8 = vld [vmem:[%s630_s2] ss:$0 sm:$0xff]  ;;  %517 = vrcp.f32 %v529_v20  ;;  %s273_s8 = scalar_lea.vmem %s635_s7, %s468_s11 }
   0xe   : > { %v275_v4 = vld [vmem:[%s269_s14] sm:$0xff] }
   0xf   : > { %v276_v5 = vpack.c.bf16 %v275_v4, %v275_v4  ;;  %v514_v14 = vld [vmem:[%s632_s4] ss:$0 sm:$0xff] }
  0x10   : > { %308 = vmatpush.bf16.msra.mxu0 %v498_v2  ;;  %361 = vmatpush.bf16.msra.mxu1 %v502_v3  ;;  %v515_v41 = vld [vmem:[%s633_s5] ss:$0 sm:$0xff] }
  0x11   : > { %v516_v43 = vld [vmem:[%s634_s6] ss:$0 sm:$0xff] }
  0x13   : > { %478 = vmatmul.msk.bf16.vlgmr.msra.gmra.mxu0 %vm297_vm0, %v276_v5  ;;  %v518_v21 = vpop.eup %517 }
  0x14   : > { %362 = vmatpush.bf16.msra.mxu1 %v501_v6  ;;  %v376_v22 = vmul.f32 32.0, %v518_v21  ;;  %vm380_vm2 = vweird.f32 %v518_v21 }
  0x16   : > { %v377_v23 = vsub.f32 1.0, %v376_v22 }
  0x18   : > { %363 = vmatpush.bf16.msra.mxu1 %v500_v7  ;;  %v378_v24 = vmul.f32 %v518_v21, %v377_v23 }
  0x1a   : > { %v379_v25 = vadd.f32 %v518_v21, %v378_v24 }
  0x1c   : > { %v381_v26 = vsel %vm380_vm2, %v518_v21, %v379_v25 }
  0x90   : > { %v310_v9 = vpop.f32.mrf.mxu0 }
  0x91   : > { %v311_v10 = vadd.f32 %v513_v8, %v310_v9 }
  0x93   : > { %v314_v11 = vmax.f32 %v311_v10, 0.0 }
  0x95   : > { %v315_v12 = vpack.c.bf16 %v314_v11, %v314_v11 }
  0x97   : > { %495 = vmatmul.msk.bf16.vlgmr.msra.gmra.mxu1 %vm352_vm1, %v315_v12 }
  0x98   : > { %v312_v13 = vpop.f32.mrf.mxu0 }
 0x114   : > { %v365_v15 = vpop.f32.mrf.mxu1 }
 0x115   : > { %v366_v16 = vadd.f32 %v514_v14, %v365_v15 }
 0x117   : > { %v369_v17 = vadd.f32 %v366_v16, %v275_v4 }
 0x119   : > { %v372_v18 = vsel %vm297_vm0, %v369_v17, 0.0 }
 0x11a   : > { %373 = vadd.xlane.f32.xlu0 %v372_v18 }
 0x11c   : > { %v367_v19 = vpop.f32.mrf.mxu1 }
 0x18d   : > { %v374_v27 = vpop.xlane.xlu0 %373 }
 0x18e   : > { %v382_v28 = vmul.f32 %v381_v26, %v374_v27 }
 0x190   : > { %v383_v29 = vsub.f32 %v369_v17, %v382_v28 }
 0x192   : > { %v384_v30 = vmul.f32 %v383_v29, %v383_v29 }
 0x194   : > { %v385_v31 = vsel %vm297_vm0, %v384_v30, 0.0 }
 0x195   : > { %386 = vadd.xlane.f32.xlu0 %v385_v31 }
 0x208   : > { %v387_v32 = vpop.xlane.xlu0 %386 }
 0x209   : > { %v388_v33 = vmul.f32 %v387_v32, %v381_v26 }
 0x20b   : > { %v389_v34 = vadd.f32 1e-05, %v388_v33 }
 0x20d   : > { %519 = vrsqrt.f32 %v389_v34  ;;  %vm396_vm4 = vweird.f32 %v389_v34 }
 0x213   : > { %v520_v35 = vpop.eup %519 }
 0x214   : > { %v391_v36 = vmul.f32 %v520_v35, %v389_v34  ;;  %vm397_vm3 = vweird.f32 %v520_v35 }
 0x215   : > { %vm398_vm5 = vmor %vm396_vm4, %vm397_vm3 }
 0x216   : > { %v392_v37 = vmul.f32 %v520_v35, %v391_v36 }
 0x218   : > { %v393_v38 = vmul.f32 0.5, %v392_v37 }
 0x21a   : > { %v394_v39 = vsub.f32 1.5, %v393_v38 }
 0x21c   : > { %v395_v40 = vmul.f32 %v520_v35, %v394_v39 }
 0x21e   : > { %v399_v42 = vsel %vm398_vm5, %v520_v35, %v395_v40 }
 0x21f   : > { %v400_v44 = vmul.f32 %v399_v42, %v383_v29 }
 0x221   : > { %v404_v45 = vmul.f32 %v515_v41, %v400_v44 }
 0x223   : > { %v408_v46 = vadd.f32 %v516_v43, %v404_v45 }
 0x225   : > { %409 = vst.msk [vmem:[%s273_s8] sm:$0xff] %vm297_vm0, %v408_v46 }
 0x226 PF: > { %s17_s24 = sadd.s32 1, %s527_s24  }
 0x227   : > { %p14_p4 = scmp.ge.s32.totalorder %s17_s24, 4  }
 0x229   :  { %16 = sbr.rel (!%p14_p4) target bundleno = 1 (0x1), region = 78 }

// kernel: decoder_layer_forward.3
= control target key start
LH: loop header
LB: loop body
LE: loop exit
PB: predicated region body
PF: predicated region fallthrough
CT: control target
= control target key end

     0   :  { %s1529_s21 = smov 0   ;;  %s1531_s22 = smov 0   ;;  %s1705_s0 = inlined_call_operand.vmem [shape: f32[2,8,32], index: 0, kind: input, shape index: {}, may-alias: {0,2}]   ;;  %s1706_s1 = inlined_call_operand.vmem [shape: f32[2,8,32], index: 1, kind: input, shape index: {}, may-alias: {1,3}]   ;;  %s1707_s2 = inlined_call_operand.vmem [shape: f32[2,8,32], index: 2, kind: input, shape index: {}, may-alias: {0,2}]   ;;  %s1708_s3 = inlined_call_operand.vmem [shape: f32[2,8,32], index: 3, kind: input, shape index: {}, may-alias: {1,3}]   ;;  %s1709_s4 = inlined_call_operand.vmem [shape: f32[2,1,8], index: 4, kind: input, shape index: {}]   ;;  %s1710_s5 = inlined_call_operand.vmem [shape: f32[8,8], index: 5, kind: input, shape index: {}]   ;;  %s1711_s6 = inlined_call_operand.vmem [shape: bf16[4,32,8], index: 6, kind: input, shape index: {}]   ;;  %s1712_s7 = inlined_call_operand.vmem [shape: bf16[4,32,8], index: 7, kind: input, shape index: {}]   ;;  %s1713_s8 = inlined_call_operand.vmem [shape: bf16[4,32,8], index: 8, kind: input, shape index: {}]   ;;  %s1714_s9 = inlined_call_operand.vmem [shape: f32[4,1,8], index: 9, kind: input, shape index: {}]   ;;  %s1715_s10 = inlined_call_operand.vmem [shape: f32[4,1,8], index: 10, kind: input, shape index: {}]   ;;  %s1716_s11 = inlined_call_operand.vmem [shape: f32[4,1,8], index: 11, kind: input, shape index: {}]   ;;  %s1717_s12 = inlined_call_operand.vmem [shape: bf16[4,8,32], index: 12, kind: input, shape index: {}]   ;;  %s1718_s13 = inlined_call_operand.vmem [shape: f32[1,32], index: 13, kind: input, shape index: {}]   ;;  %s1719_s14 = inlined_call_operand.vmem [shape: f32[1,32], index: 14, kind: input, shape index: {}]   ;;  %s1720_s15 = inlined_call_operand.vmem [shape: f32[1,32], index: 15, kind: input, shape index: {}]   ;;  %s1721_s16 = inlined_call_operand.vmem [shape: f32[2,8,32], index: 16, kind: output, shape index: {}]  }
   0x1   :  { %1726 = sst [smem:[#allocation10_spill]] %s1705_s0  ;;  %s1533_s23 = smov 0  }
   0x2   :  { %1727 = sst [smem:[#allocation11_spill]] %s1707_s2  ;;  %s1535_s24 = smov 0  }
   0x3   :  { %1728 = sst [smem:[#allocation12_spill]] %s1708_s3  ;;  %s1537_s25 = smov 0  }
   0x4   :  { %1729 = sst [smem:[#allocation13_spill]] %s1709_s4 }
   0x5   :  { %1730 = sst [smem:[#allocation14_spill]] %s1710_s5 }
   0x6   :  { %1731 = sst [smem:[#allocation15_spill]] %s1711_s6 }
   0x7   :  { %1732 = sst [smem:[#allocation16_spill]] %s1718_s13 }
   0x8   :  { %1733 = sst [smem:[#allocation17_spill]] %s1719_s14 }
   0x9   :  { %1734 = sst [smem:[#allocation18_spill]] %s1720_s15 }
   0xa   :  { %1735 = sst [smem:[#allocation19_spill]] %s1721_s16 }
   0xb LB: > { %1736 = sst [smem:[#allocation4_spill]] %s1423_s21  ;;  %s38_s26 = sadd.s32 1, %s1431_s23  ;;  %s1439_s25 = sphi %s1537_s25, %s26_s25   ;;  %s1435_s24 = sphi %s1535_s24, %s1765_s24   ;;  %s1431_s23 = sphi %s1533_s23, %s1764_s23   ;;  %s1427_s22 = sphi %s1531_s22, %s1763_s22   ;;  %s1423_s21 = sphi %s1529_s21, %s1762_s21  }
   0xc   : > { %1737 = sst [smem:[#allocation5_spill]] %s1431_s23  ;;  %s45_s27 = sadd.s32 1, %s1435_s24 }
   0xd   : > { %1738 = sst [smem:[#allocation6_spill]] %s1435_s24  ;;  %p39_p0 = scmp.ge.s32.totalorder %s38_s26, 4 }
   0xe   : > { %1739 = sst [smem:[#allocation7_spill]] %s1439_s25  ;;  %p1288_p1 = scmp.ge.s32.totalorder %s1439_s25, 1 }
   0xf   : > { %p599_p2 = scmp.lt.s32.totalorder %s1439_s25, 9  ;;  %s1767_s26 = smov (%p39_p0, %s38_s26), 0 }
  0x10   : > { %1740 = sst [smem:[#allocation8_spill]] %s1767_s26  ;;  %s1769_s27 = smov (!%p39_p0, %s45_s27), %s1435_s24 }
  0x11   : > { %p600_p3 = pnand %p1288_p1, %p599_p2  ;;  %p47_p4 = scmp.ge.s32.totalorder %s1769_s27, 2 }
  0x12   : > { %p703_p5 = scmp.lt.s32.totalorder (!%p600_p3), %s1427_s22, 1  ;;  %p732_p6 = scmp.lt.s32.totalorder (!%p600_p3), %s1423_s21, 3 }
  0x13   : > { %s1771_s27 = smov (%p47_p4, %s1769_s27), 0  ;;  %603 = sbr.rel (%p600_p3) target bundleno = 1289 (0x509), region = 84 }
  0x14   : > { %1741 = sst [smem:[#allocation9_spill]] %s1771_s27 }
  0x15   : > { %s1744_s2 = sld [smem:[#allocation11_spill]] (!%p600_p3) }
  0x16   : > { %s1745_s3 = sld [smem:[#allocation12_spill]] (!%p600_p3) }
  0x17   : > { %s1746_s6 = sld [smem:[#allocation15_spill]] (!%p600_p3) }
  0x18   : > { %s1773_s22 = smov (!%p703_p5, %s1427_s22), 1 }
  0x19   : > { %s1565_s28 = scalar_select %p732_p6, %s1423_s21, 3 }
  0x1a   : > { %s1568_s29 = sshll.u32 %s1773_s22, 3 }
  0x1b   : > { %s720_s14 = scalar_lea.vmem %s1744_s2, %s1568_s29  ;;  %s1335_s5 = sshll.u32 %s1565_s28, 4 }
  0x1c   : > { %s724_s0 = scalar_lea.vmem %s1745_s3, %s1568_s29  ;;  %s741_s26 = scalar_lea.vmem %s1712_s7, %s1335_s5 }
  0x1d   : > { %s736_s19 = scalar_lea.vmem %s1746_s6, %s1335_s5  ;;  %s1604_s25 = scalar_lea.vmem %s1713_s8, %s1335_s5 }
  0x1e   : > { %s752_s27 = scalar_lea.vmem %s1715_s10, %s1565_s28  ;;  %s755_s21 = scalar_lea.vmem %s1716_s11, %s1565_s28 }
  0x1f   : > { %s1299_s17 = sshll.u32 %s1565_s28, 2  ;;  %s1747_s6 = sld [smem:[#allocation19_spill]] }
  0x20   : > { %s1618_s3 = scalar_lea.vmem %s1717_s12, %s1299_s17  ;;  %s1748_s5 = sld [smem:[#allocation4_spill]] }
  0x25   : > { %s766_s23 = scalar_lea.vmem %s1747_s6, %s1568_s29 }
  0x26   : > { %p1301_p7 = scmp.ne.s32.totalorder %s1748_s5, 0 }
  0x28   : > { %771 = sbr.rel (%p1301_p7) target bundleno = 47 (0x2f), region = 88 }
  0x2d   : > { %vm772_vm0 = vcmask 261120   ;;  %v1441_v0 = vmov 0.0  }
  0x2e   : > { %773 = vst.msk [vmem:[#allocation2] sm:$0xff] %vm772_vm0, %v1441_v0 }
  0x2f PF: > { %v1341_v1 = vld [vmem:[%s741_s26 + $0x8] sm:$0xff]  ;;  %v778_v2 = vld [vmem:[%s720_s14] sm:$0xff]  ;;  %vm803_vm1 = vcmask 261120   ;;  %s1749_s17 = sld [smem:[#allocation10_spill]]  ;;  %s1751_s14 = scalar_lea.vmem %s1706_s1, %s1568_s29  ;;  %vm938_vm2 = vcmask 1043456   ;;  %vm934_vm3 = vcmask 64512  }
  0x30   : > { %v779_v3 = vld [vmem:[%s724_s0] sm:$0xff]  ;;  %849 = vmatpush.bf16.msra.mxu1 %v1341_v1  ;;  %v1339_v7 = vld [vmem:[%s736_s19 + $0x8] sm:$0xff]  ;;  %s1752_s16 = scalar_lea.vmem %s1714_s9, %s1565_s28  ;;  %v782_v27 = vpack.c.bf16 %v778_v2, %v778_v2  ;;  %s1753_s4 = sld [smem:[#allocation13_spill]]  ;;  %v1442_v29 = vmov 0.0  }
  0x31   : > { %v1340_v4 = vld [vmem:[%s741_s26] sm:$0xff]  ;;  %v780_v5 = vadd.f32 %v779_v3, %v778_v2  ;;  %813 = vmatpush.bf16.msra.mxu0 %v1339_v7  ;;  %v1343_v25 = vld [vmem:[%s1604_s25 + $0x8] sm:$0xff]  ;;  %s1755_s5 = sld [smem:[#allocation14_spill]] }
  0x32   : > { %v775_v9 = vld [vmem:[%s1751_s14] sm:$0xff]  ;;  %885 = vmatpush.bf16.msra.mxu2 %v1343_v25 }
  0x33   : > { %v781_v6 = vpack.c.bf16 %v780_v5, %v780_v5  ;;  %v1338_v10 = vld [vmem:[%s736_s19] sm:$0xff] }
  0x34   : > { %850 = vmatpush.bf16.msra.mxu1 %v1340_v4  ;;  %v1387_v13 = vld [vmem:[%s752_s27] ss:$0 sm:$0xff] }
  0x35   : > { %s1750_s15 = scalar_lea.vmem %s1749_s17, %s1568_s29  ;;  %814 = vmatpush.bf16.msra.mxu0 %v1338_v10  ;;  %v1388_v19 = vld [vmem:[%s1752_s16] ss:$0 sm:$0xff] }
  0x36   : > { %v1631_v8 = vld [vmem:[%s1750_s15] sm:$0xff]  ;;  %s1754_s18 = scalar_lea.vmem %s1753_s4, %s1773_s22 }
  0x37   : > { %1319 = vmatmul.msk.bf16.vlgmr.msra.gmra.mxu1 %vm803_vm1, %v781_v6  ;;  %v776_v11 = vadd.f32 %v775_v9, %v1631_v8  ;;  %v1342_v26 = vld [vmem:[%s1604_s25] sm:$0xff] }
  0x38   : > { %886 = vmatpush.bf16.msra.mxu2 %v1342_v26  ;;  %v892_v28 = vld [vmem:[%s1754_s18] sm:$0x1] }
  0x39   : > { %v777_v12 = vpack.c.bf16 %v776_v11, %v776_v11  ;;  %vm893_vm4 = vcmp.gt.f32.partialorder %v892_v28, 0.5  ;;  %v895_v32 = vld [vmem:[%s1755_s5] sm:$0xff] }
  0x3a   : > { %v894_v30 = vsel %vm893_vm4, -1e+30, %v1442_v29  ;;  %v1389_v39 = vld [vmem:[%s755_s21] ss:$0 sm:$0xff] }
  0x3b   : > { %1310 = vmatmul.msk.bf16.vlgmr.msra.gmra.mxu0 %vm803_vm1, %v777_v12  ;;  %1328 = vmatmul.msk.bf16.vlgmr.msra.gmra.mxu2 %vm803_vm1, %v782_v27  ;;  %v897_v31 = vperm.slane %v894_v30, 0  ;;  %v991_v50 = vld [vmem:[%s1618_s3] sm:$0xf]  ;;  %s1756_s3 = sld [smem:[#allocation4_spill]] }
  0x3c   : > { %v996_v51 = vsel %vm938_vm2, %v991_v50, 0  ;;  %v989_v59 = vld [vmem:[#allocation2] sm:$0xff] }
  0x3d   : > { %v899_v33 = vadd.f32 %v897_v31, %v895_v32  ;;  %1005 = vmatpush.bf16.msrb.mxu0 %v996_v51 }
  0x41   : > { %p1332_p8 = scmp.ne.s32.totalorder %s1756_s3, 3 }
  0x42   : > { %s1757_s2 = sld [smem:[#allocation16_spill]] (!%p1332_p8) }
  0x43   : > { %s1758_s15 = sld [smem:[#allocation17_spill]] (!%p1332_p8) }
  0x44   : > { %s1759_s14 = sld [smem:[#allocation18_spill]] (!%p1332_p8) }
  0xb4   : > { %v852_v14 = vpop.f32.mrf.mxu1 }
  0xb5   : > { %v853_v15 = vadd.f32 %v1387_v13, %v852_v14 }
  0xb7   : > { %901 = vxpose.xlu0.b32.start.end [1/1] (short) (narrow) %v853_v15, 8 }
  0xb8   : > { %v816_v17 = vpop.f32.mrf.mxu0 }
  0xb9   : > { %v817_v20 = vadd.f32 %v1388_v19, %v816_v17 }
  0xbb   : > { %v900_v23 = vpack.c.bf16 %v817_v20, %v817_v20 }
  0xbc   : > { %v854_v16 = vpop.f32.mrf.mxu1 }
  0xbe   : > { %v888_v40 = vpop.f32.mrf.mxu2 }
  0xbf   : > { %v889_v41 = vadd.f32 %v1389_v39, %v888_v40 }
  0xc0   : > { %v818_v18 = vpop.f32.mrf.mxu0 }
  0xc1   : > { %v969_v42 = vpack.c.bf16 %v889_v41, %v889_v41 }
  0xc3   : > { %v974_v44 = vsel %vm938_vm2, %v969_v42, 0 }
  0xc6   : > { %v890_v47 = vpop.f32.mrf.mxu2 }
 0x15b   : > { %v917_v21 = vpop.trf.xlu0 }
 0x15c   : > { %v933_v22 = vpack.c.bf16 %v917_v21, %v917_v21 }
 0x15e   : > { %v940_v24 = vsel %vm938_vm2, %v933_v22, 0 }
 0x15f   : > { %949 = vmatpush.bf16.msra.mxu3 %v940_v24 }
 0x162   : > { %1329 = vmatmul.msk.bf16.vlgmr.msra.gmra.mxu3 %vm934_vm3, %v900_v23 }
 0x163   : > { %983 = vmatpush.bf16.msrb.mxu3 %v974_v44 }
 0x1e5   : > { %v951_v34 = vpop.f32.mrf.mxu3 }
 0x1e6   : > { %v955_v35 = vmul.f32 0.35355338, %v951_v34 }
 0x1e8   : > { %v956_v36 = vadd.f32 %v955_v35, %v899_v33 }
 0x1ea   : > { %v957_v37 = vsel %vm934_vm3, %v956_v36, -inf }
 0x1eb   : > { %958 = vmax.xlane.f32.xlu0 %v957_v37 }
 0x1ed   : > { %v953_v38 = vpop.f32.mrf.mxu3 }
 0x25e   : > { %v959_v43 = vpop.xlane.xlu0 %958 }
 0x25f   : > { %v960_v45 = vsub.f32 %v956_v36, %v959_v43 }
 0x261   : > { %v961_v46 = vmul.f32 1.442695, %v960_v45 }
 0x263   : > { %1390 = vpow2.f32 %v961_v46 }
 0x269   : > { %v1391_v48 = vpop.eup %1390 }
 0x26a   : > { %v963_v49 = vsel %vm934_vm3, %v1391_v48, 0.0 }
 0x26b   : > { %964 = vadd.xlane.f32.xlu1 %v963_v49 }
 0x2de   : > { %v965_v52 = vpop.xlane.xlu1 %964 }
 0x2df   : > { %1392 = vrcp.f32 %v965_v52 }
 0x2e5   : > { %v1393_v53 = vpop.eup %1392 }
 0x2e6   : > { %v967_v54 = vmul.f32 %v1393_v53, %v1391_v48 }
 0x2e8   : > { %v968_v55 = vpack.c.bf16 %v967_v54, %v967_v54 }
 0x2ea   : > { %1330 = vmatmul.msk.bf16.vlgmr.msrb.gmra.mxu3 %vm934_vm3, %v968_v55 }
 0x36d   : > { %v985_v56 = vpop.f32.mrf.mxu3 }
 0x36e   : > { %v990_v57 = vpack.c.bf16 %v985_v56, %v985_v56 }
 0x370   : > { %1331 = vmatmul.msk.bf16.vlgmr.msrb.gmra.mxu0 %vm934_vm3, %v990_v57 }
 0x375   : > { %v987_v58 = vpop.f32.mrf.mxu3 }
 0x3ed   : > { %v1007_v60 = vpop.f32.mrf.mxu0 }
 0x3ee   : > { %v1011_v61 = vadd.f32 %v1007_v60, %v989_v59 }
 0x3f0   : > { %1012 = vst.msk [vmem:[#allocation2] sm:$0xff] %vm803_vm1, %v1011_v61 }
 0x3f1   : > { %1016 = sbr.rel (%p1332_p8) target bundleno = 1289 (0x509), region = 92 }
 0x3f5   : > { %v1009_v62 = vpop.f32.mrf.mxu0 }
 0x3f6   : > { %v1394_v0 = vld [vmem:[%s1757_s2] ss:$0 sm:$0xff]  ;;  %v1443_v4 = vmov 32.0  }
 0x3f7   : > { %v1017_v63 = vld [vmem:[#allocation2] sm:$0xff]  ;;  %1397 = vrcp.f32 %v1443_v4 }
 0x3f8   : > { %v1018_v1 = vadd.f32 %v1017_v63, %v1631_v8  ;;  %v1395_v25 = vld [vmem:[%s1758_s15] ss:$0 sm:$0xff] }
 0x3f9   : > { %v1396_v27 = vld [vmem:[%s1759_s14] ss:$0 sm:$0xff] }
 0x3fa   : > { %v1023_v2 = vadd.f32 %v1394_v0, %v1018_v1 }
 0x3fc   : > { %v1026_v3 = vsel %vm803_vm1, %v1023_v2, 0.0 }
 0x3fd   : > { %1027 = vadd.xlane.f32.xlu0 %v1026_v3  ;;  %v1398_v5 = vpop.eup %1397 }
 0x3fe   : > { %v1030_v6 = vmul.f32 32.0, %v1398_v5  ;;  %vm1034_vm5 = vweird.f32 %v1398_v5 }
 0x400   : > { %v1031_v7 = vsub.f32 1.0, %v1030_v6 }
 0x402   : > { %v1032_v9 = vmul.f32 %v1398_v5, %v1031_v7 }
 0x404   : > { %v1033_v10 = vadd.f32 %v1398_v5, %v1032_v9 }
 0x406   : > { %v1035_v11 = vsel %vm1034_vm5, %v1398_v5, %v1033_v10 }
 0x470   : > { %v1028_v12 = vpop.xlane.xlu0 %1027 }
 0x471   : > { %v1036_v13 = vmul.f32 %v1035_v11, %v1028_v12 }
 0x473   : > { %v1037_v14 = vsub.f32 %v1023_v2, %v1036_v13 }
 0x475   : > { %v1038_v15 = vmul.f32 %v1037_v14, %v1037_v14 }
 0x477   : > { %v1039_v16 = vsel %vm803_vm1, %v1038_v15, 0.0 }
 0x478   : > { %1040 = vadd.xlane.f32.xlu0 %v1039_v16 }
 0x4eb   : > { %v1041_v8 = vpop.xlane.xlu0 %1040 }
 0x4ec   : > { %v1042_v17 = vmul.f32 %v1041_v8, %v1035_v11 }
 0x4ee   : > { %v1043_v18 = vadd.f32 1e-05, %v1042_v17 }
 0x4f0   : > { %1399 = vrsqrt.f32 %v1043_v18  ;;  %vm1050_vm7 = vweird.f32 %v1043_v18 }
 0x4f6   : > { %v1400_v19 = vpop.eup %1399 }
 0x4f7   : > { %v1045_v20 = vmul.f32 %v1400_v19, %v1043_v18  ;;  %vm1051_vm6 = vweird.f32 %v1400_v19 }
 0x4f8   : > { %vm1052_vm8 = vmor %vm1050_vm7, %vm1051_vm6 }
 0x4f9   : > { %v1046_v21 = vmul.f32 %v1400_v19, %v1045_v20 }
 0x4fb   : > { %v1047_v22 = vmul.f32 0.5, %v1046_v21 }
 0x4fd   : > { %v1048_v23 = vsub.f32 1.5, %v1047_v22 }
 0x4ff   : > { %v1049_v24 = vmul.f32 %v1400_v19, %v1048_v23 }
 0x501   : > { %v1053_v26 = vsel %vm1052_vm8, %v1400_v19, %v1049_v24 }
 0x502   : > { %v1054_v28 = vmul.f32 %v1053_v26, %v1037_v14 }
 0x504   : > { %v1058_v29 = vmul.f32 %v1395_v25, %v1054_v28 }
 0x506   : > { %v1062_v30 = vadd.f32 %v1396_v27, %v1058_v29 }
 0x508   : > { %1063 = vst.msk [vmem:[%s766_s23] sm:$0xff] %vm803_vm1, %v1062_v30 }
 0x509 PF: > { %s1761_s27 = sld [smem:[#allocation7_spill]] }
 0x50a   : > { %s1762_s21 = sld [smem:[#allocation5_spill]] }
 0x50b   : > { %s1763_s22 = sld [smem:[#allocation6_spill]] }
 0x50c   : > { %s1764_s23 = sld [smem:[#allocation8_spill]] }
 0x50d   : > { %s1765_s24 = sld [smem:[#allocation9_spill]] }
 0x50f   : > { %s26_s25 = sadd.s32 1, %s1761_s27  }
 0x510   : > { %p23_p9 = scmp.ge.s32.totalorder %s26_s25, 10  }
 0x512   :  { %25 = sbr.rel (!%p23_p9) target bundleno = 11 (0xb), region = 158 }

// kernel: decoder_layer_forward.4
= control target key start
LH: loop header
LB: loop body
LE: loop exit
PB: predicated region body
PF: predicated region fallthrough
CT: control target
= control target key end

     0   :  { %s1936_s0 = inlined_call_operand.vmem [shape: f32[2,8,32], index: 0, kind: input, shape index: {}]   ;;  %s1937_s1 = inlined_call_operand.vmem [shape: f32[2,8,32], index: 1, kind: input, shape index: {}]   ;;  %s1938_s2 = inlined_call_operand.vmem [shape: f32[2,12,32], index: 2, kind: input, shape index: {}]   ;;  %s1939_s3 = inlined_call_operand.vmem [shape: f32[2,12,32], index: 3, kind: input, shape index: {}]   ;;  %s1940_s4 = inlined_call_operand.vmem [shape: f32[2,1,12], index: 4, kind: input, shape index: {}]   ;;  %s1941_s5 = inlined_call_operand.vmem [shape: bf16[4,32,8], index: 5, kind: input, shape index: {}]   ;;  %s1942_s6 = inlined_call_operand.vmem [shape: bf16[4,32,8], index: 6, kind: input, shape index: {}]   ;;  %s1943_s7 = inlined_call_operand.vmem [shape: bf16[4,32,8], index: 7, kind: input, shape index: {}]   ;;  %s1944_s8 = inlined_call_operand.vmem [shape: f32[4,1,8], index: 8, kind: input, shape index: {}]   ;;  %s1945_s9 = inlined_call_operand.vmem [shape: f32[4,1,8], index: 9, kind: input, shape index: {}]   ;;  %s1946_s10 = inlined_call_operand.vmem [shape: f32[4,1,8], index: 10, kind: input, shape index: {}]   ;;  %s1947_s11 = inlined_call_operand.vmem [shape: bf16[4,8,32], index: 11, kind: input, shape index: {}]   ;;  %s1948_s12 = inlined_call_operand.vmem [shape: f32[1,32], index: 12, kind: input, shape index: {}]   ;;  %s1949_s13 = inlined_call_operand.vmem [shape: f32[1,32], index: 13, kind: input, shape index: {}]   ;;  %s1950_s14 = inlined_call_operand.vmem [shape: f32[1,32], index: 14, kind: input, shape index: {}]   ;;  %s1951_s15 = inlined_call_operand.vmem [shape: f32[2,8,32], index: 15, kind: output, shape index: {0}]   ;;  %s1952_s16 = inlined_call_operand.hbm [shape: f32[2,8,12], index: 16, kind: output, shape index: {1}]  }
   0x1   :  { %1968 = sst [smem:[#allocation20_spill]] %s1936_s0 }
   0x2   :  { %1969 = sst [smem:[#allocation21_spill]] %s1938_s2 }
   0x3   :  { %1970 = sst [smem:[#allocation22_spill]] %s1939_s3 }
   0x4   :  { %1971 = sst [smem:[#allocation23_spill]] %s1940_s4 }
   0x5   :  { %1972 = sst [smem:[#allocation24_spill]] %s1941_s5 }
   0x6   :  { %1973 = sst [smem:[#allocation25_spill]] %s1942_s6 }
   0x7   :  { %1974 = sst [smem:[#allocation26_spill]] %s1943_s7 }
   0x8   :  { %1975 = sst [smem:[#allocation27_spill]] %s1946_s10 }
   0x9   :  { %1976 = sst [smem:[#allocation28_spill]] %s1947_s11 }
   0xa   :  { %1977 = sst [smem:[#allocation29_spill]] %s1948_s12 }
   0xb   :  { %1978 = sst [smem:[#allocation30_spill]] %s1949_s13 }
   0xc   :  { %1979 = sst [smem:[#allocation31_spill]] %s1950_s14 }
   0xd   :  { %1980 = sst [smem:[#allocation32_spill]] %s1951_s15 }
   0xe   :  { %1981 = sst [smem:[#allocation33_spill]] %s1952_s16 }
   0xf   :  { %22 = vsyncpa [#allocation5], 0 }
  0x10   :  { %24 = vsyncpa [#allocation5 + $0x1], 0  ;;  %s1676_s21 = smov 0   ;;  %s1678_s22 = smov 0  }
  0x11   :  { %s1680_s23 = smov 0   ;;  %s1682_s24 = smov 0  }
  0x12   :  { %s1684_s25 = smov 0   ;;  %s1686_s26 = smov 0  }
  0x13   :  { %s1688_s27 = smov 0   ;;  %s1690_s28 = smov 0  }
  0x14 LB: > { %1982 = sst [smem:[#allocation7_spill]] %s1558_s21  ;;  %s1337_s29 = sadd.s32 4294967295, %s1586_s28   ;;  %s1586_s28 = sphi %s1690_s28, %s30_s28   ;;  %s1582_s27 = sphi %s1688_s27, %s2034_s27   ;;  %s1578_s26 = sphi %s1686_s26, %s2033_s26   ;;  %s1574_s25 = sphi %s1684_s25, %s2032_s25   ;;  %s1570_s24 = sphi %s1682_s24, %s2031_s24   ;;  %s1566_s23 = sphi %s1680_s23, %s2030_s23   ;;  %s1562_s22 = sphi %s1678_s22, %s2029_s22   ;;  %s1558_s21 = sphi %s1676_s21, %s2028_s21  }
  0x15   : > { %1983 = sst [smem:[#allocation8_spill]] %s1562_s22  ;;  %s1338_s30 = sadd.s32 4294967294, %s1586_s28  }
  0x16   : > { %1984 = sst [smem:[#allocation9_spill]] %s1566_s23  ;;  %s42_s0 = sadd.s32 1, %s1578_s26 }
  0x17   : > { %1985 = sst [smem:[#allocation10_spill]] %s1570_s24  ;;  %p43_p0 = scmp.ge.s32.totalorder %s42_s0, 4 }
  0x18   : > { %1986 = sst [smem:[#allocation11_spill]] %s1574_s25  ;;  %s49_s17 = sadd.s32 1, %s1582_s27 }
  0x19   : > { %1987 = sst [smem:[#allocation12_spill]] %s1578_s26  ;;  %p475_p1 = scmp.ne.s32.totalorder %s1566_s23, %s1562_s22 }
  0x1a   : > { %1988 = sst [smem:[#allocation13_spill]] %s1582_s27  ;;  %p476_p2 = scmp.eq.s32.totalorder %s1337_s29, 7 }
  0x1b   : > { %1989 = sst [smem:[#allocation14_spill]] %s1586_s28  ;;  %s2036_s0 = smov (%p43_p0, %s42_s0), 0 }
  0x1c   : > { %1990 = sst [smem:[#allocation15_spill]] %s2036_s0  ;;  %s2038_s17 = smov (!%p43_p0, %s49_s17), %s1582_s27 }
  0x1d   : > { %p1725_p3 = por %p476_p2, %p475_p1  ;;  %p481_p4 = scmp.ne.s32.totalorder %s1562_s22, %s1558_s21 }
  0x1e   : > { %p51_p5 = scmp.ge.s32.totalorder %s2038_s17, 2  ;;  %p482_p6 = scmp.eq.s32.totalorder %s1338_s30, 7 }
  0x1f   : > { %s1991_s18 = scalar_select %p1725_p3, 1, 0 }
  0x20   : > { %p1341_p7 = scmp.ge.s32.totalorder %s1586_s28, 1  ;;  %p600_p8 = scmp.lt.s32.totalorder %s1586_s28, 9 }
  0x21   : > { %1992 = sst [smem:[#allocation16_spill]] %s1991_s18  ;;  %s2040_s17 = smov (%p51_p5, %s2038_s17), 0 }
  0x22   : > { %1993 = sst [smem:[#allocation17_spill]] %s2040_s17  ;;  %p1735_p9 = por %p482_p6, %p481_p4 }
  0x23   : > { %p601_p10 = pnand %p1341_p7, %p600_p8  ;;  %s460_s20 = ssub.s32 %s1582_s27, %s2040_s17 }
  0x24   : > { %s1994_s19 = scalar_select %p1735_p9, 1, 0 }
  0x25   : > { %s465_s29 = sadd.s32 1, %s1566_s23  ;;  %p463_p11 = scmp.eq.s32.totalorder %s460_s20, 0 }
  0x26   : > { %1995 = sst [smem:[#allocation18_spill]] %s1994_s19  ;;  %604 = sbr.rel (%p601_p10) target bundleno = 1332 (0x534), region = 80 }
  0x27   : > { %s1743_s0 = scalar_select %p463_p11, %s1566_s23, %s465_s29  }
  0x28   : > { %s1955_s30 = sand.u32 (!%p601_p10), 1, %s1562_s22   ;;  %p707_p12 = scmp.lt.s32.totalorder (!%p601_p10), %s1574_s25, 1 }
  0x29   : > { %1996 = sst [smem:[#allocation19_spill]] %s1743_s0  ;;  %s1749_s26 = sshll.u32 (!%p601_p10), %s1955_s30, 3 }
  0x2a   : > { %p734_p13 = scmp.lt.s32.totalorder (!%p601_p10), %s1570_s24, 3  ;;  %s1998_s2 = sld [smem:[#allocation21_spill]] (!%p601_p10) }
  0x2b   : > { %s1753_s19 = scalar_select %p707_p12, %s1574_s25, 1 }
  0x2c   : > { %s1756_s20 = scalar_select %p734_p13, %s1570_s24, 3 }
  0x2d   : > { %s1759_s29 = sshll.u32 %s1753_s19, 3  ;;  %s1393_s30 = sshll.u32 %s1753_s19, 4 }
  0x2e   : > { %s1999_s3 = sld [smem:[#allocation22_spill]]  ;;  %s1395_s10 = sshll.u32 %s1756_s20, 4 }
  0x2f   : > { %s2001_s5 = sld [smem:[#allocation24_spill]]  ;;  %s751_s11 = scalar_lea.vmem %s1944_s8, %s1756_s20 }
  0x30   : > { %s725_s25 = scalar_lea.vmem %s1998_s2, %s1393_s30  ;;  %s2002_s6 = sld [smem:[#allocation25_spill]] }
  0x31   : > { %s2003_s7 = sld [smem:[#allocation26_spill]]  ;;  %s754_s15 = scalar_lea.vmem %s1945_s9, %s1756_s20 }
  0x32   : > { %s2004_s2 = sld [smem:[#allocation27_spill]]  ;;  %s706_s13 = scalar_lea.vmem [#allocation4], %s1749_s26 }
  0x33   : > { %s2006_s18 = sld [smem:[#allocation28_spill]] }
  0x34   : > { %s730_s12 = scalar_lea.vmem %s1999_s3, %s1393_s30  ;;  %s2007_s14 = sld [smem:[#allocation10_spill]] }
  0x35   : > { %s1784_s0 = scalar_lea.vmem %s2001_s5, %s1395_s10  ;;  %s1355_s5 = sshll.u32 %s1756_s20, 2 }
  0x36   : > { %s743_s16 = scalar_lea.vmem %s2002_s6, %s1395_s10  ;;  %s2005_s6 = sld [smem:[#allocation32_spill]] }
  0x37   : > { %s1792_s23 = scalar_lea.vmem %s2003_s7, %s1395_s10 }
  0x38   : > { %s757_s3 = scalar_lea.vmem %s2004_s2, %s1756_s20 }
  0x39   : > { %s1814_s7 = scalar_lea.vmem %s2006_s18, %s1355_s5 }
  0x3a   : > { %p1357_p0 = scmp.ne.s32.totalorder %s2007_s14, 0 }
  0x3c   : > { %s768_s4 = scalar_lea.vmem %s2005_s6, %s1759_s29  ;;  %773 = sbr.rel (%p1357_p0) target bundleno = 68 (0x44), region = 84 }
  0x41   : > { %vm774_vm0 = vcmask 261120   ;;  %vm776_vm1 = vcmask 97280   ;;  %v1588_v0 = vmov 0.0  }
  0x42   : > { %775 = vst.msk [vmem:[#allocation2] sm:$0xff] %vm774_vm0, %v1588_v0 }
  0x43   : > { %777 = vst.msk [vmem:[#allocation3] sm:$0xff] %vm776_vm1, %v1588_v0 }
  0x44 PF: > { %v1401_v1 = vld [vmem:[%s743_s16 + $0x8] sm:$0xff]  ;;  %v1400_v2 = vld [vmem:[%s743_s16] sm:$0xff]  ;;  %vm810_vm2 = vcmask 261120   ;;  %s2008_s6 = sld [smem:[#allocation20_spill]]  ;;  %vm942_vm3 = vcmask 1043456   ;;  %vm938_vm4 = vcmask 64512  }
  0x45   : > { %v782_v3 = vld [vmem:[%s725_s25] sm:$0xff]  ;;  %v783_v4 = vld [vmem:[%s725_s25 + $0x8] sm:$0xf]  ;;  %856 = vmatpush.bf16.msra.mxu1 %v1401_v1  ;;  %s2011_s21 = sld [smem:[#allocation23_spill]]  ;;  %v1589_v33 = vmov 0.0   ;;  %vm964_vm6 = vcmask 97280  }
  0x46   : > { %v784_v5 = vld [vmem:[%s730_s12] sm:$0xff]  ;;  %v785_v6 = vld [vmem:[%s730_s12 + $0x8] sm:$0xf]  ;;  %s2010_s12 = scalar_lea.vmem %s1937_s1, %s1759_s29  ;;  %v789_v31 = vpack.c.bf16 %v783_v4, %v782_v3  ;;  %vm981_vm7 = vcmask 1045504  }
  0x47   : > { %v786_v7 = vadd.f32 %v784_v5, %v782_v3  ;;  %v787_v8 = vadd.f32 %v785_v6, %v783_v4  ;;  %v1399_v10 = vld [vmem:[%s1784_s0 + $0x8] sm:$0xff]  ;;  %v779_v12 = vld [vmem:[%s2010_s12] sm:$0xff] }
  0x48   : > { %820 = vmatpush.bf16.msra.mxu0 %v1399_v10  ;;  %v1398_v13 = vld [vmem:[%s1784_s0] sm:$0xff]  ;;  %v1403_v29 = vld [vmem:[%s1792_s23 + $0x8] sm:$0xff] }
  0x49   : > { %v788_v9 = vpack.c.bf16 %v787_v8, %v786_v7  ;;  %857 = vmatpush.bf16.msra.mxu1 %v1400_v2  ;;  %v1478_v16 = vld [vmem:[%s754_s15] ss:$0 sm:$0xff]  ;;  %893 = vmatpush.bf16.msra.mxu2 %v1403_v29 }
  0x4a   : > { %s2009_s24 = scalar_lea.vmem %s2008_s6, %s1759_s29  ;;  %v1479_v23 = vld [vmem:[%s751_s11] ss:$0 sm:$0xff]  ;;  %v1022_v57 = vld [vmem:[#allocation3] sm:$0xff] }
  0x4b   : > { %v1825_v11 = vld [vmem:[%s2009_s24] sm:$0xff]  ;;  %s2012_s28 = scalar_lea.vmem %s2011_s21, %s1753_s19 }
  0x4c   : > { %1375 = vmatmul.msk.bf16.vlgmr.msra.gmra.mxu1 %vm810_vm2, %v788_v9  ;;  %v780_v14 = vadd.f32 %v779_v12, %v1825_v11  ;;  %821 = vmatpush.bf16.msra.mxu0 %v1398_v13  ;;  %v1402_v30 = vld [vmem:[%s1792_s23] sm:$0xff] }
  0x4d   : > { %894 = vmatpush.bf16.msra.mxu2 %v1402_v30  ;;  %v901_v32 = vld [vmem:[%s2012_s28] sm:$0x1] }
  0x4e   : > { %v781_v15 = vpack.c.bf16 %v780_v14, %v780_v14  ;;  %vm902_vm5 = vcmp.gt.f32.partialorder %v901_v32, 0.5  ;;  %v1480_v42 = vld [vmem:[%s757_s3] ss:$0 sm:$0xff]  ;;  %s2014_s3 = sld [smem:[#allocation10_spill]] }
  0x4f   : > { %v903_v34 = vsel %vm902_vm5, -1e+30, %v1589_v33  ;;  %v1000_v53 = vld [vmem:[%s1814_s7] sm:$0xf] }
  0x50   : > { %1366 = vmatmul.msk.bf16.vlgmr.msra.gmra.mxu0 %vm810_vm2, %v781_v15  ;;  %1384 = vmatmul.msk.bf16.vlgmr.msra.gmra.mxu2 %vm810_vm2, %v789_v31  ;;  %v961_v35 = vperm.slane %v903_v34, 0  ;;  %v1005_v54 = vsel %vm942_vm3, %v1000_v53, 0  ;;  %v998_v0 = vld [vmem:[#allocation2] sm:$0xff] }
  0x51   : > { %1014 = vmatpush.bf16.msrb.mxu0 %v1005_v54 }
  0x54   : > { %p1388_p1 = scmp.ne.s32.totalorder %s2014_s3, 3 }
  0x55   : > { %s2015_s20 = sld [smem:[#allocation29_spill]] (!%p1388_p1) }
  0x56   : > { %s2016_s2 = sld [smem:[#allocation30_spill]] (!%p1388_p1) }
  0x57   : > { %s2017_s24 = sld [smem:[#allocation31_spill]] (!%p1388_p1) }
  0xc9   : > { %v859_v17 = vpop.f32.mrf.mxu1 }
  0xca   : > { %v860_v18 = vadd.f32 %v1478_v16, %v859_v17 }
  0xcc   : > { %905 = vxpose.xlu0.b32.start [1/2] (short) (narrow) %v860_v18, 8 }
  0xcd   : > { %v823_v21 = vpop.f32.mrf.mxu0 }
  0xce   : > { %v824_v24 = vadd.f32 %v1479_v23, %v823_v21 }
  0xd0   : > { %v904_v27 = vpack.c.bf16 %v824_v24, %v824_v24 }
  0xd1   : > { %v861_v19 = vpop.f32.mrf.mxu1 }
  0xd2   : > { %v862_v20 = vadd.f32 %v1478_v16, %v861_v19 }
  0xd3   : > { %v896_v41 = vpop.f32.mrf.mxu2 }
  0xd4   : > { %906 = vxpose.xlu0.b32.end [2/2] (short) (narrow) %v862_v20, 8  ;;  %v897_v45 = vadd.f32 %v1480_v42, %v896_v41 }
  0xd5   : > { %v825_v22 = vpop.f32.mrf.mxu0 }
  0xdb   : > { %v898_v47 = vpop.f32.mrf.mxu2 }
  0xdc   : > { %v899_v48 = vadd.f32 %v1480_v42, %v898_v47 }
  0xde   : > { %v977_v49 = vpack.c.bf16 %v899_v48, %v897_v45 }
  0xe0   : > { %v983_v50 = vsel %vm981_vm7, %v977_v49, 0 }
 0x170   : > { %v921_v25 = vpop.trf.xlu0 }
 0x171   : > { %v937_v26 = vpack.c.bf16 %v921_v25, %v921_v25 }
 0x173   : > { %v944_v28 = vsel %vm942_vm3, %v937_v26, 0 }
 0x174   : > { %953 = vmatpush.bf16.msra.mxu3 %v944_v28 }
 0x177   : > { %1385 = vmatmul.msk.bf16.vlgmr.msra.gmra.mxu3 %vm938_vm4, %v904_v27 }
 0x178   : > { %992 = vmatpush.bf16.msrb.mxu3 %v983_v50 }
 0x1fa   : > { %v955_v36 = vpop.f32.mrf.mxu3 }
 0x1fb   : > { %v959_v37 = vmul.f32 0.35355338, %v955_v36 }
 0x1fd   : > { %v963_v38 = vadd.f32 %v961_v35, %v959_v37 }
 0x1ff   : > { %v965_v39 = vsel %vm964_vm6, %v963_v38, -inf }
 0x200   : > { %966 = vmax.xlane.f32.xlu1 %v965_v39 }
 0x202   : > { %v957_v40 = vpop.f32.mrf.mxu3 }
 0x273   : > { %v967_v43 = vpop.xlane.xlu1 %966 }
 0x274   : > { %v968_v44 = vsub.f32 %v963_v38, %v967_v43 }
 0x276   : > { %v969_v46 = vmul.f32 1.442695, %v968_v44 }
 0x278   : > { %1481 = vpow2.f32 %v969_v46 }
 0x27e   : > { %v1482_v51 = vpop.eup %1481 }
 0x27f   : > { %v971_v52 = vsel %vm964_vm6, %v1482_v51, 0.0 }
 0x280   : > { %972 = vadd.xlane.f32.xlu1 %v971_v52 }
 0x2f3   : > { %v973_v55 = vpop.xlane.xlu1 %972 }
 0x2f4   : > { %1483 = vrcp.f32 %v973_v55 }
 0x2fa   : > { %v1484_v56 = vpop.eup %1483 }
 0x2fb   : > { %v975_v58 = vmul.f32 %v1484_v56, %v1482_v51 }
 0x2fd   : > { %v1023_v59 = vadd.f32 %v1022_v57, %v975_v58  ;;  %v976_v60 = vpack.c.bf16 %v975_v58, %v975_v58 }
 0x2ff   : > { %1024 = vst.msk [vmem:[#allocation3] sm:$0xff] %vm964_vm6, %v1023_v59  ;;  %1386 = vmatmul.msk.bf16.vlgmr.msrb.gmra.mxu3 %vm964_vm6, %v976_v60 }
 0x382   : > { %v994_v61 = vpop.f32.mrf.mxu3 }
 0x383   : > { %v999_v62 = vpack.c.bf16 %v994_v61, %v994_v61 }
 0x385   : > { %1387 = vmatmul.msk.bf16.vlgmr.msrb.gmra.mxu0 %vm938_vm4, %v999_v62 }
 0x38a   : > { %v996_v63 = vpop.f32.mrf.mxu3 }
 0x402   : > { %v1016_v1 = vpop.f32.mrf.mxu0 }
 0x403   : > { %v1020_v2 = vadd.f32 %v1016_v1, %v998_v0 }
 0x405   : > { %1021 = vst.msk [vmem:[#allocation2] sm:$0xff] %vm810_vm2, %v1020_v2 }
 0x406   : > { %1028 = sbr.rel (%p1388_p1) target bundleno = 1310 (0x51e), region = 88 }
 0x40a   : > { %v1018_v3 = vpop.f32.mrf.mxu0 }
 0x40b   : > { %v1485_v5 = vld [vmem:[%s2015_s20] ss:$0 sm:$0xff]  ;;  %v1590_v9 = vmov 32.0   ;;  %v1076_v21 = vld [vmem:[#allocation3] sm:$0xff] }
 0x40c   : > { %v1029_v4 = vld [vmem:[#allocation2] sm:$0xff]  ;;  %1488 = vrcp.f32 %v1590_v9  ;;  %v1077_v22 = vmul.f32 0.25, %v1076_v21 }
 0x40d   : > { %v1030_v6 = vadd.f32 %v1029_v4, %v1825_v11  ;;  %v1486_v32 = vld [vmem:[%s2016_s2] ss:$0 sm:$0xff] }
 0x40e   : > { %1078 = vst.msk [vmem:[%s706_s13] sm:$0xff] %vm964_vm6, %v1077_v22  ;;  %v1487_v34 = vld [vmem:[%s2017_s24] ss:$0 sm:$0xff] }
 0x40f   : > { %v1035_v7 = vadd.f32 %v1485_v5, %v1030_v6 }
 0x411   : > { %v1038_v8 = vsel %vm810_vm2, %v1035_v7, 0.0 }
 0x412   : > { %1039 = vadd.xlane.f32.xlu0 %v1038_v8  ;;  %v1489_v10 = vpop.eup %1488 }
 0x413   : > { %v1042_v12 = vmul.f32 32.0, %v1489_v10  ;;  %vm1046_vm8 = vweird.f32 %v1489_v10 }
 0x415   : > { %v1043_v13 = vsub.f32 1.0, %v1042_v12 }
 0x417   : > { %v1044_v14 = vmul.f32 %v1489_v10, %v1043_v13 }
 0x419   : > { %v1045_v15 = vadd.f32 %v1489_v10, %v1044_v14 }
 0x41b   : > { %v1047_v16 = vsel %vm1046_vm8, %v1489_v10, %v1045_v15 }
 0x485   : > { %v1040_v17 = vpop.xlane.xlu0 %1039 }
 0x486   : > { %v1048_v18 = vmul.f32 %v1047_v16, %v1040_v17 }
 0x488   : > { %v1049_v19 = vsub.f32 %v1035_v7, %v1048_v18 }
 0x48a   : > { %v1050_v20 = vmul.f32 %v1049_v19, %v1049_v19 }
 0x48c   : > { %v1051_v11 = vsel %vm810_vm2, %v1050_v20, 0.0 }
 0x48d   : > { %1052 = vadd.xlane.f32.xlu0 %v1051_v11 }
 0x500   : > { %v1053_v23 = vpop.xlane.xlu0 %1052 }
 0x501   : > { %v1054_v24 = vmul.f32 %v1053_v23, %v1047_v16 }
 0x503   : > { %v1055_v25 = vadd.f32 1e-05, %v1054_v24 }
 0x505   : > { %1490 = vrsqrt.f32 %v1055_v25  ;;  %vm1062_vm10 = vweird.f32 %v1055_v25 }
 0x50b   : > { %v1491_v26 = vpop.eup %1490 }
 0x50c   : > { %v1057_v27 = vmul.f32 %v1491_v26, %v1055_v25  ;;  %vm1063_vm9 = vweird.f32 %v1491_v26 }
 0x50d   : > { %vm1064_vm11 = vmor %vm1062_vm10, %vm1063_vm9 }
 0x50e   : > { %v1058_v28 = vmul.f32 %v1491_v26, %v1057_v27 }
 0x510   : > { %v1059_v29 = vmul.f32 0.5, %v1058_v28 }
 0x512   : > { %v1060_v30 = vsub.f32 1.5, %v1059_v29 }
 0x514   : > { %v1061_v31 = vmul.f32 %v1491_v26, %v1060_v30 }
 0x516   : > { %v1065_v33 = vsel %vm1064_vm11, %v1491_v26, %v1061_v31 }
 0x517   : > { %v1066_v35 = vmul.f32 %v1065_v33, %v1049_v19 }
 0x519   : > { %v1070_v36 = vmul.f32 %v1486_v32, %v1066_v35 }
 0x51b   : > { %v1074_v37 = vadd.f32 %v1487_v34, %v1070_v36 }
 0x51d   : > { %1075 = vst.msk [vmem:[%s768_s4] sm:$0xff] %vm810_vm2, %v1074_v37 }
 0x51e PF: > { %s2019_s30 = sld [smem:[#allocation11_spill]]  ;;  %s1103_s23 = sshll.u32 %s706_s13, 4  ;;  %s1104_s23 = int_to_ptr.vmem [resolvable:$true] %s1103_s23 }
 0x51f   : > { %s2020_s27 = sld [smem:[#allocation8_spill]] }
 0x520   : > { %s2022_s21 = sld [smem:[#allocation33_spill]] }
 0x524   : > { %s1390_s17 = sshll.u32 %s2019_s30, 3 }
 0x525   : > { %s2024_s3 = sand.u32 1, %s2020_s27  }
 0x526   : > { %s2023_s10 = smov %s2022_s21  ;;  %s1101_s28 = scalar_lea.hbm %s2022_s21, %s1390_s17 }
 0x527   : > { %s1105_s22 = sshll.u32 %s1101_s28, 4  ;;  %s1087_s7 = scalar_lea.sflag [#allocation5], %s2024_s3  ;;  %s1106_s22 = int_to_ptr.hbm [resolvable:$true] %s1105_s22 }
 0x528   : > { %s1506_s19 = sshra.s32 %s1106_s22, 4  ;;  %s1512_s18 = scalar_lea.hbm %s2023_s10, 16  ;;  %s1507_s19 = int_to_ptr.hbm [resolvable:$true] %s1506_s19 }
 0x529   : > { %s1508_s4 = scalar_lea.hbm %s1507_s19, 8  ;;  %p1513_p6 = scmp.lt.s32.totalorder %s1507_s19, %s2023_s10 }
 0x52a   : > { %p1509_p2 = scmp.ne.s32.totalorder %s1507_s19, %s1508_s4  ;;  %p1514_p7 = scmp.lt.s32.totalorder %s1512_s18, %s1508_s4 }
 0x52c   : > { %p1510_p4 = pnand %p1509_p2, %p1725_p3  ;;  %p1515_p8 = por %p1514_p7, %p1513_p6 }
 0x52e   : > { %p1511_p5 = pneg %p1510_p4 }
 0x530   : > { %p1516_p10 = pnand %p1515_p8, %p1511_p5 }
 0x532   : > { %1519 = shalt.err (!%p1516_p10)
}
 0x533   : > { %1404 = dma.vmem_to_hbm [thread:$0]  (%p1725_p3), %s1104_s23, 128, %s1106_s22, %s1087_s7  }
 0x534 PF: > { %s2025_s26 = sld [smem:[#allocation14_spill]] }
 0x535   : > { %s2026_s13 = sld [smem:[#allocation7_spill]] }
 0x53a   : > { %p1410_p11 = scmp.ge.s32.totalorder %s2025_s26, 2 }
 0x53b   : > { %s1127_s6 = sand.u32 1, %s2026_s13  }
 0x53c   : > { %p1407_p12 = pnand %p1410_p11, %p1735_p9  ;;  %s1128_s24 = scalar_lea.sflag [#allocation5], %s1127_s6 }
 0x53e   : > { %p1408_p13 = pneg %p1407_p12 }
 0x540   : > { %1553 = dma.done.wait (%p1408_p13), %s1128_s24, 128  }
 0x541   : > { %1555 = vsyncadd (%p1408_p13), %s1128_s24, 4294967168  ;;  %s30_s28 = sadd.s32 1, %s2025_s26   ;;  %s2028_s21 = sld [smem:[#allocation8_spill]] }
 0x542   : > { %p27_p0 = scmp.ge.s32.totalorder %s30_s28, 10   ;;  %s2029_s22 = sld [smem:[#allocation9_spill]] }
 0x543   : > { %s2030_s23 = sld [smem:[#allocation19_spill]] }
 0x544   : > { %s2031_s24 = sld [smem:[#allocation12_spill]]  ;;  %29 = sbr.rel (!%p27_p0) target bundleno = 20 (0x14), region = 168 }
 0x545   : > { %s2032_s25 = sld [smem:[#allocation13_spill]] }
 0x546   : > { %s2033_s26 = sld [smem:[#allocation15_spill]] }
 0x547   : > { %s2034_s27 = sld [smem:[#allocation17_spill]] }
 0x549   :  { %1134 = vsyncpa [#allocation5], 1 }
 0x54a   :  { %1136 = vsyncpa [#allocation5 + $0x1], 1 }

</bundles_post_ra>
